<compile_context>
chip_gen: v7x
topology: tpu7x:2x2x1
jax: 0.10.0
libtpu: 0.0.40
codegen_flags: <defaults>
</compile_context>

<pallas_src>
import jax
import jax.numpy as jnp
from jax.experimental import pallas as pl
from jax.experimental.pallas import tpu as pltpu
import numpy as np


# ---------------------------------------------------------------------------
# In-kernel helpers
# ---------------------------------------------------------------------------
def _im2col(x, th, w, c1, col_ref):
    """Scatter the 9 conv taps of x ((th+2, w+2, c1)) into col_ref ((th*w, 9*c1))."""
    for dy in range(3):
        for dx in range(3):
            j0 = (dy * 3 + dx) * c1
            col_ref[:, j0:j0 + c1] = (
                x[dy:dy + th, dx:dx + w, :].reshape(th * w, c1))
    return col_ref[...]


def _stats_kernel(x_ref, w_ref, sum_ref, sq_ref, col_ref):
    # x_ref: (1, th+2, w+2, c1)   w_ref: (9*c1, 4*Cout)
    # sum_ref / sq_ref: (1, 1, 4*Cout)   col_ref: VMEM (th*w, 9*c1)
    x = x_ref[0]
    th, w, c1 = x.shape[0] - 2, x.shape[1] - 2, x.shape[2]
    patches = _im2col(x, th, w, c1, col_ref)
    z = jnp.dot(patches, w_ref[...], preferred_element_type=jnp.float32)
    # Channel reductions as ones-vector matmuls (MXU) instead of XLU axis-0 sums.
    ones = jnp.ones((1, th * w), jnp.float32)
    sum_ref[0] = jnp.dot(ones, z, preferred_element_type=jnp.float32)
    sq_ref[0] = jnp.dot(ones, z * z, preferred_element_type=jnp.float32)


def _conv_bn_relu_kernel(x_ref, w_ref, scale_ref, shift_ref, o_ref, col_ref):
    # Fused (deconv o conv3x3) + BatchNorm-normalize + ReLU for one row band.
    x = x_ref[0]
    th, w, c1 = x.shape[0] - 2, x.shape[1] - 2, x.shape[2]
    patches = _im2col(x, th, w, c1, col_ref)
    z = jnp.dot(patches, w_ref[...], preferred_element_type=jnp.float32)
    o_ref[0] = jnp.maximum(z * scale_ref[...] + shift_ref[...], 0.0)


# ---------------------------------------------------------------------------
# Trace-time weight composition:
#   ConvTranspose2d(k=2,s=2)+bias  followed by  Conv2d(3x3, pad=1)
# == one 3x3 conv over the original-resolution input (+ ones channel) whose
#    output channels are the 4 sub-pixels x Cout.
# ---------------------------------------------------------------------------
def _fold_weights(wt, bt, wc):
    cin, cout = wt.shape[0], wt.shape[1]
    c1 = cin + 1
    # Extra "ones" channel carries the deconv bias bt (zero in the pad ring).
    wt_aug = jnp.concatenate(
        [wt.astype(jnp.float32),
         jnp.broadcast_to(bt.astype(jnp.float32)[None, :, None, None],
                          (1, cout, 2, 2))], axis=0)
    w_eff = jnp.zeros((3, 3, c1, 2, 2, cout), jnp.float32)
    for a_sub in range(2):          # output sub-pixel row
        for u in range(3):          # conv3x3 row tap
            t = a_sub + u - 1
            ti, a = t // 2 + 1, t % 2
            for b_sub in range(2):  # output sub-pixel col
                for v in range(3):  # conv3x3 col tap
                    s = b_sub + v - 1
                    tj, b = s // 2 + 1, s % 2
                    contrib = jnp.einsum('kc,oc->ko',
                                         wt_aug[:, :, a, b],
                                         wc[:, :, u, v].astype(jnp.float32))
                    w_eff = w_eff.at[ti, tj, :, a_sub, b_sub, :].add(contrib)
    # (tap_dy, tap_dx, ci) x (A, B, o)  ->  (9*C1, 4*Cout)
    return w_eff.reshape(9 * c1, 4 * cout)


def _pick_band_rows(H, W, c1, c4, target_bytes=4 << 20):
    """Largest divisor of H whose per-band working set stays ~target_bytes."""
    best = 1
    for th in range(1, H + 1):
        if H % th:
            continue
        band = th * W * (c4 + 9 * c1) * 4 + (th + 2) * (W + 2) * c1 * 4
        if band <= target_bytes:
            best = th
    return best


# ---------------------------------------------------------------------------
# Wrapper: BlueBlock forward.  x is NCHW (PyTorch convention).
# ---------------------------------------------------------------------------
def blue_block(x_nchw, wt, bt, wc, bc, gamma, beta, *, band_rows=None, eps=1e-5):
    del bc  # exactly cancelled by batch-statistics BatchNorm -> dropped.
    N, Cin, H, W = x_nchw.shape
    Cout = wt.shape[1]
    C1, C4 = Cin + 1, 4 * Cout

    w_mat = _fold_weights(wt, bt, wc)                       # (9*C1, C4)

    # NHWC + ones channel + zero pad (the zero-padded ones channel reproduces
    # the conv's zero padding / deconv-bias border behaviour exactly).
    x = jnp.transpose(x_nchw, (0, 2, 3, 1)).astype(jnp.float32)
    x = jnp.concatenate([x, jnp.ones((N, H, W, 1), jnp.float32)], axis=-1)
    xp = jnp.pad(x, ((0, 0), (1, 1), (1, 1), (0, 0)))       # (N, H+2, W+2, C1)

    TH = band_rows if band_rows is not None else _pick_band_rows(H, W, C1, C4)
    assert H % TH == 0, (H, TH)
    NB = H // TH
    # Overlapping row bands with a 2-row halo, duplicated on the SMALL
    # original-resolution input so plain Blocked BlockSpecs suffice.
    xb = jnp.stack([xp[:, b * TH:b * TH + TH + 2] for b in range(NB)], axis=1)
    xb = xb.reshape(N * NB, TH + 2, W + 2, C1)

    grid = (N * NB,)
    x_spec = pl.BlockSpec((1, TH + 2, W + 2, C1), lambda i: (i, 0, 0, 0))
    w_spec = pl.BlockSpec((9 * C1, C4), lambda i: (0, 0))
    col_scratch = pltpu.VMEM((TH * W, 9 * C1), jnp.float32)
    par = pltpu.CompilerParams(dimension_semantics=("parallel",))

    # ---- Pass 1: per-band channel sum / sum-of-squares (reads small input only)
    bsum, bsq = pl.pallas_call(
        _stats_kernel,
        out_shape=(jax.ShapeDtypeStruct((N * NB, 1, C4), jnp.float32),
                   jax.ShapeDtypeStruct((N * NB, 1, C4), jnp.float32)),
        grid=grid,
        in_specs=[x_spec, w_spec],
        out_specs=(pl.BlockSpec((1, 1, C4), lambda i: (i, 0, 0)),
                   pl.BlockSpec((1, 1, C4), lambda i: (i, 0, 0))),
        scratch_shapes=[col_scratch],
        compiler_params=par,
    )(xb, w_mat)

    # Tiny XLA combine: fold bands and the 4 sub-pixel groups into Cout stats.
    # NOTE: E[x^2]-E[x]^2 in f32 is fine here; switch to a two-level centered
    # accumulation if activations become very large / poorly scaled.
    s_c = jnp.sum(bsum, axis=(0, 1)).reshape(4, Cout).sum(axis=0)
    q_c = jnp.sum(bsq, axis=(0, 1)).reshape(4, Cout).sum(axis=0)
    cnt = jnp.float32(N * 4 * H * W)                        # = N * (2H) * (2W)
    mean = s_c / cnt
    var = jnp.maximum(q_c / cnt - mean * mean, 0.0)         # biased (BN training)
    scale_c = gamma.astype(jnp.float32) * jax.lax.rsqrt(var + eps)
    shift_c = beta.astype(jnp.float32) - mean * scale_c
    scale4 = jnp.tile(scale_c, (4,)).reshape(1, C4)
    shift4 = jnp.tile(shift_c, (4,)).reshape(1, C4)

    # ---- Pass 2: fused conv + BN-normalize + ReLU; activation hits HBM once.
    z = pl.pallas_call(
        _conv_bn_relu_kernel,
        out_shape=jax.ShapeDtypeStruct((N * NB, TH * W, C4), jnp.float32),
        grid=grid,
        in_specs=[x_spec, w_spec,
                  pl.BlockSpec((1, C4), lambda i: (0, 0)),
                  pl.BlockSpec((1, C4), lambda i: (0, 0))],
        out_specs=pl.BlockSpec((1, TH * W, C4), lambda i: (i, 0, 0)),
        scratch_shapes=[col_scratch],
        compiler_params=par,
    )(xb, w_mat, scale4, shift4)

    # Pixel shuffle + NCHW (single XLA transpose; required for PyTorch layout).
    z = z.reshape(N, H, W, 2, 2, Cout)                      # [n, I, J, A, B, o]
    out = z.transpose(0, 5, 1, 3, 2, 4).reshape(N, Cout, 2 * H, 2 * W)
    return out


# ---------------------------------------------------------------------------
# Pure-JAX reference (mirrors PyTorch semantics) for a sanity check.
# ---------------------------------------------------------------------------
def blue_block_ref(x, wt, bt, wc, bc, gamma, beta, eps=1e-5):
    # ConvTranspose2d(k=2, s=2) == conv with lhs_dilation=2, pad=1, flipped
    # kernel, in/out channels swapped.
    w_eq = jnp.flip(jnp.transpose(wt, (1, 0, 2, 3)), axis=(2, 3))
    y = jax.lax.conv_general_dilated(
        x, w_eq, window_strides=(1, 1), padding=((1, 1), (1, 1)),
        lhs_dilation=(2, 2), dimension_numbers=('NCHW', 'OIHW', 'NCHW'))
    y = y + bt[None, :, None, None]
    z = jax.lax.conv_general_dilated(
        y, wc, window_strides=(1, 1), padding=((1, 1), (1, 1)),
        dimension_numbers=('NCHW', 'OIHW', 'NCHW'))
    z = z + bc[None, :, None, None]
    mean = jnp.mean(z, axis=(0, 2, 3), keepdims=True)
    var = jnp.mean((z - mean) ** 2, axis=(0, 2, 3), keepdims=True)
    zn = (z - mean) / jnp.sqrt(var + eps)
    zn = zn * gamma[None, :, None, None] + beta[None, :, None, None]
    return jnp.maximum(zn, 0.0)


if __name__ == "__main__":
    in_planes, out_planes = 4, 8
    N, H, W = 2, 16, 16

    key = jax.random.PRNGKey(0)
    k1, k2, k3, k4, k5 = jax.random.split(key, 5)
    x = jax.random.normal(k1, (N, in_planes, H, W), jnp.float32)
    # ConvTranspose2d weight: (in_planes, out_planes, 2, 2)
    wt = 0.2 * jax.random.normal(k2, (in_planes, out_planes, 2, 2), jnp.float32)
    bt = 0.1 * jax.random.normal(k3, (out_planes,), jnp.float32)
    # Conv2d weight: (out_planes, out_planes, 3, 3)
    wc = 0.1 * jax.random.normal(k4, (out_planes, out_planes, 3, 3), jnp.float32)
    bc = 0.1 * jax.random.normal(k5, (out_planes,), jnp.float32)
    # BatchNorm2d default init: weight=1, bias=0
    gamma = jnp.ones((out_planes,), jnp.float32)
    beta = jnp.zeros((out_planes,), jnp.float32)

    fn = jax.jit(blue_block, static_argnames=("band_rows",))
    # band_rows=8 -> 2 row bands per image, exercising the halo/banding path.
    out = jax.block_until_ready(fn(x, wt, bt, wc, bc, gamma, beta, band_rows=8))

    ref = jax.block_until_ready(blue_block_ref(x, wt, bt, wc, bc, gamma, beta))
    assert out.shape == (N, out_planes, 2 * H, 2 * W), out.shape
    np.testing.assert_allclose(np.asarray(out), np.asarray(ref),
                               rtol=1e-4, atol=1e-4)
    print("KERNEL_OK")
</pallas_src>

<mosaic_0001>
module attributes {stable_mosaic.version = 11 : i64} {
  func.func @_stats_kernel(%arg0: i32, %arg1: memref<1x10x18x5xf32, #tpu.memory_space<vmem>>, %arg2: memref<45x32xf32, #tpu.memory_space<vmem>>, %arg3: memref<1x1x32xf32, #tpu.memory_space<vmem>>, %arg4: memref<1x1x32xf32, #tpu.memory_space<vmem>>, %arg5: memref<128x45xf32, #tpu.memory_space<vmem>>) attributes {dimension_semantics = [#tpu.dimension_semantics<parallel>], iteration_bounds = array<i64: 4>, scalar_prefetch = 0 : i64, scratch_operands = 1 : i64, tpu.core_type = #tpu.core_type<tc>, window_params = [{transform_indices = @transform_0, window_bounds = array<i64: 1, 10, 18, 5>}, {pipeline_mode = #tpu.pipeline_mode<synchronous>, transform_indices = @transform_1, window_bounds = array<i64: 45, 32>}, {transform_indices = @transform_2, window_bounds = array<i64: 1, 1, 32>}, {transform_indices = @transform_3, window_bounds = array<i64: 1, 1, 32>}]} {
    %c0 = arith.constant 0 : index
    %c0_0 = arith.constant 0 : index
    %c0_1 = arith.constant 0 : index
    %c0_2 = arith.constant 0 : index
    %0 = vector.load %arg1[%c0, %c0_0, %c0_1, %c0_2] : memref<1x10x18x5xf32, #tpu.memory_space<vmem>>, vector<1x10x18x5xf32>
    %1 = vector.shape_cast %0 : vector<1x10x18x5xf32> to vector<10x18x5xf32>
    %2 = vector.extract_strided_slice %1 {offsets = [0, 0, 0], sizes = [8, 16, 5], strides = [1, 1, 1]} : vector<10x18x5xf32> to vector<8x16x5xf32>
    %3 = vector.shape_cast %2 : vector<8x16x5xf32> to vector<128x5xf32>
    %c0_3 = arith.constant 0 : index
    %c0_4 = arith.constant 0 : index
    %4 = vector.load %arg5[%c0_3, %c0_4] : memref<128x45xf32, #tpu.memory_space<vmem>>, vector<128x5xf32>
    tpu.vector_store %arg5[%c0_3, %c0_4], %3 {strides = array<i32>} : memref<128x45xf32, #tpu.memory_space<vmem>>, vector<128x5xf32>,
    %5 = vector.extract_strided_slice %1 {offsets = [0, 1, 0], sizes = [8, 16, 5], strides = [1, 1, 1]} : vector<10x18x5xf32> to vector<8x16x5xf32>
    %6 = vector.shape_cast %5 : vector<8x16x5xf32> to vector<128x5xf32>
    %c0_5 = arith.constant 0 : index
    %c5 = arith.constant 5 : index
    %7 = vector.load %arg5[%c0_5, %c5] : memref<128x45xf32, #tpu.memory_space<vmem>>, vector<128x5xf32>
    tpu.vector_store %arg5[%c0_5, %c5], %6 {strides = array<i32>} : memref<128x45xf32, #tpu.memory_space<vmem>>, vector<128x5xf32>,
    %8 = vector.extract_strided_slice %1 {offsets = [0, 2, 0], sizes = [8, 16, 5], strides = [1, 1, 1]} : vector<10x18x5xf32> to vector<8x16x5xf32>
    %9 = vector.shape_cast %8 : vector<8x16x5xf32> to vector<128x5xf32>
    %c0_6 = arith.constant 0 : index
    %c10 = arith.constant 10 : index
    %10 = vector.load %arg5[%c0_6, %c10] : memref<128x45xf32, #tpu.memory_space<vmem>>, vector<128x5xf32>
    tpu.vector_store %arg5[%c0_6, %c10], %9 {strides = array<i32>} : memref<128x45xf32, #tpu.memory_space<vmem>>, vector<128x5xf32>,
    %11 = vector.extract_strided_slice %1 {offsets = [1, 0, 0], sizes = [8, 16, 5], strides = [1, 1, 1]} : vector<10x18x5xf32> to vector<8x16x5xf32>
    %12 = vector.shape_cast %11 : vector<8x16x5xf32> to vector<128x5xf32>
    %c0_7 = arith.constant 0 : index
    %c15 = arith.constant 15 : index
    %13 = vector.load %arg5[%c0_7, %c15] : memref<128x45xf32, #tpu.memory_space<vmem>>, vector<128x5xf32>
    tpu.vector_store %arg5[%c0_7, %c15], %12 {strides = array<i32>} : memref<128x45xf32, #tpu.memory_space<vmem>>, vector<128x5xf32>,
    %14 = vector.extract_strided_slice %1 {offsets = [1, 1, 0], sizes = [8, 16, 5], strides = [1, 1, 1]} : vector<10x18x5xf32> to vector<8x16x5xf32>
    %15 = vector.shape_cast %14 : vector<8x16x5xf32> to vector<128x5xf32>
    %c0_8 = arith.constant 0 : index
    %c20 = arith.constant 20 : index
    %16 = vector.load %arg5[%c0_8, %c20] : memref<128x45xf32, #tpu.memory_space<vmem>>, vector<128x5xf32>
    tpu.vector_store %arg5[%c0_8, %c20], %15 {strides = array<i32>} : memref<128x45xf32, #tpu.memory_space<vmem>>, vector<128x5xf32>,
    %17 = vector.extract_strided_slice %1 {offsets = [1, 2, 0], sizes = [8, 16, 5], strides = [1, 1, 1]} : vector<10x18x5xf32> to vector<8x16x5xf32>
    %18 = vector.shape_cast %17 : vector<8x16x5xf32> to vector<128x5xf32>
    %c0_9 = arith.constant 0 : index
    %c25 = arith.constant 25 : index
    %19 = vector.load %arg5[%c0_9, %c25] : memref<128x45xf32, #tpu.memory_space<vmem>>, vector<128x5xf32>
    tpu.vector_store %arg5[%c0_9, %c25], %18 {strides = array<i32>} : memref<128x45xf32, #tpu.memory_space<vmem>>, vector<128x5xf32>,
    %20 = vector.extract_strided_slice %1 {offsets = [2, 0, 0], sizes = [8, 16, 5], strides = [1, 1, 1]} : vector<10x18x5xf32> to vector<8x16x5xf32>
    %21 = vector.shape_cast %20 : vector<8x16x5xf32> to vector<128x5xf32>
    %c0_10 = arith.constant 0 : index
    %c30 = arith.constant 30 : index
    %22 = vector.load %arg5[%c0_10, %c30] : memref<128x45xf32, #tpu.memory_space<vmem>>, vector<128x5xf32>
    tpu.vector_store %arg5[%c0_10, %c30], %21 {strides = array<i32>} : memref<128x45xf32, #tpu.memory_space<vmem>>, vector<128x5xf32>,
    %23 = vector.extract_strided_slice %1 {offsets = [2, 1, 0], sizes = [8, 16, 5], strides = [1, 1, 1]} : vector<10x18x5xf32> to vector<8x16x5xf32>
    %24 = vector.shape_cast %23 : vector<8x16x5xf32> to vector<128x5xf32>
    %c0_11 = arith.constant 0 : index
    %c35 = arith.constant 35 : index
    %25 = vector.load %arg5[%c0_11, %c35] : memref<128x45xf32, #tpu.memory_space<vmem>>, vector<128x5xf32>
    tpu.vector_store %arg5[%c0_11, %c35], %24 {strides = array<i32>} : memref<128x45xf32, #tpu.memory_space<vmem>>, vector<128x5xf32>,
    %26 = vector.extract_strided_slice %1 {offsets = [2, 2, 0], sizes = [8, 16, 5], strides = [1, 1, 1]} : vector<10x18x5xf32> to vector<8x16x5xf32>
    %27 = vector.shape_cast %26 : vector<8x16x5xf32> to vector<128x5xf32>
    %c0_12 = arith.constant 0 : index
    %c40 = arith.constant 40 : index
    %28 = vector.load %arg5[%c0_12, %c40] : memref<128x45xf32, #tpu.memory_space<vmem>>, vector<128x5xf32>
    tpu.vector_store %arg5[%c0_12, %c40], %27 {strides = array<i32>} : memref<128x45xf32, #tpu.memory_space<vmem>>, vector<128x5xf32>,
    %c0_13 = arith.constant 0 : index
    %c0_14 = arith.constant 0 : index
    %29 = vector.load %arg5[%c0_13, %c0_14] : memref<128x45xf32, #tpu.memory_space<vmem>>, vector<128x45xf32>
    %c0_15 = arith.constant 0 : index
    %c0_16 = arith.constant 0 : index
    %30 = vector.load %arg2[%c0_15, %c0_16] : memref<45x32xf32, #tpu.memory_space<vmem>>, vector<45x32xf32>
    %cst = arith.constant dense<0.000000e+00> : vector<128x32xf32>
    %31 = tpu.matmul %29, %30, %cst {dimension_numbers = #tpu.dot_dimension_numbers<[1], [0], [0], [1], [0, 0, 1, 1], [], []>} : vector<128x45xf32>, vector<45x32xf32>, vector<128x32xf32> -> vector<128x32xf32>
    %cst_17 = arith.constant 1.000000e+00 : f32
    %32 = vector.broadcast %cst_17 : f32 to vector<1x128xf32>
    %cst_18 = arith.constant dense<0.000000e+00> : vector<1x32xf32>
    %33 = tpu.matmul %32, %31, %cst_18 {dimension_numbers = #tpu.dot_dimension_numbers<[1], [0], [0], [1], [0, 0, 1, 1], [], []>} : vector<1x128xf32>, vector<128x32xf32>, vector<1x32xf32> -> vector<1x32xf32>
    %c0_19 = arith.constant 0 : index
    %c0_20 = arith.constant 0 : index
    %c0_21 = arith.constant 0 : index
    %34 = vector.load %arg3[%c0_19, %c0_20, %c0_21] : memref<1x1x32xf32, #tpu.memory_space<vmem>>, vector<1x1x32xf32>
    %35 = vector.shape_cast %34 : vector<1x1x32xf32> to vector<1x32xf32>
    %36 = vector.shape_cast %33 : vector<1x32xf32> to vector<1x1x32xf32>
    tpu.vector_store %arg3[%c0_19, %c0_20, %c0_21], %36 {strides = array<i32>} : memref<1x1x32xf32, #tpu.memory_space<vmem>>, vector<1x1x32xf32>,
    %37 = arith.mulf %31, %31 : vector<128x32xf32>
    %cst_22 = arith.constant dense<0.000000e+00> : vector<1x32xf32>
    %38 = tpu.matmul %32, %37, %cst_22 {dimension_numbers = #tpu.dot_dimension_numbers<[1], [0], [0], [1], [0, 0, 1, 1], [], []>} : vector<1x128xf32>, vector<128x32xf32>, vector<1x32xf32> -> vector<1x32xf32>
    %c0_23 = arith.constant 0 : index
    %c0_24 = arith.constant 0 : index
    %c0_25 = arith.constant 0 : index
    %39 = vector.load %arg4[%c0_23, %c0_24, %c0_25] : memref<1x1x32xf32, #tpu.memory_space<vmem>>, vector<1x1x32xf32>
    %40 = vector.shape_cast %39 : vector<1x1x32xf32> to vector<1x32xf32>
    %41 = vector.shape_cast %38 : vector<1x32xf32> to vector<1x1x32xf32>
    tpu.vector_store %arg4[%c0_23, %c0_24, %c0_25], %41 {strides = array<i32>} : memref<1x1x32xf32, #tpu.memory_space<vmem>>, vector<1x1x32xf32>,
    return
  }
  func.func @transform_0(%arg0: i32) -> (i32, i32, i32, i32) {
    %c0_i32 = arith.constant 0 : i32
    %c0_i32_0 = arith.constant 0 : i32
    %c0_i32_1 = arith.constant 0 : i32
    %c0_i32_2 = arith.constant 0 : i32
    return %arg0, %c0_i32, %c0_i32_0, %c0_i32_1 : i32, i32, i32, i32
  }
  func.func @transform_1(%arg0: i32) -> (i32, i32) {
    %c0_i32 = arith.constant 0 : i32
    %c0_i32_0 = arith.constant 0 : i32
    %c0_i32_1 = arith.constant 0 : i32
    return %c0_i32, %c0_i32_0 : i32, i32
  }
  func.func @transform_2(%arg0: i32) -> (i32, i32, i32) {
    %c0_i32 = arith.constant 0 : i32
    %c0_i32_0 = arith.constant 0 : i32
    %c0_i32_1 = arith.constant 0 : i32
    return %arg0, %c0_i32, %c0_i32_0 : i32, i32, i32
  }
  func.func @transform_3(%arg0: i32) -> (i32, i32, i32) {
    %c0_i32 = arith.constant 0 : i32
    %c0_i32_0 = arith.constant 0 : i32
    %c0_i32_1 = arith.constant 0 : i32
    return %arg0, %c0_i32, %c0_i32_0 : i32, i32, i32
  }
}

module attributes {stable_mosaic.version = 11 : i64} {
  func.func @_conv_bn_relu_kernel(%arg0: i32, %arg1: memref<1x10x18x5xf32, #tpu.memory_space<vmem>>, %arg2: memref<45x32xf32, #tpu.memory_space<vmem>>, %arg3: memref<1x32xf32, #tpu.memory_space<vmem>>, %arg4: memref<1x32xf32, #tpu.memory_space<vmem>>, %arg5: memref<1x128x32xf32, #tpu.memory_space<vmem>>, %arg6: memref<128x45xf32, #tpu.memory_space<vmem>>) attributes {dimension_semantics = [#tpu.dimension_semantics<parallel>], iteration_bounds = array<i64: 4>, scalar_prefetch = 0 : i64, scratch_operands = 1 : i64, tpu.core_type = #tpu.core_type<tc>, window_params = [{transform_indices = @transform_0, window_bounds = array<i64: 1, 10, 18, 5>}, {pipeline_mode = #tpu.pipeline_mode<synchronous>, transform_indices = @transform_1, window_bounds = array<i64: 45, 32>}, {pipeline_mode = #tpu.pipeline_mode<synchronous>, transform_indices = @transform_2, window_bounds = array<i64: 1, 32>}, {pipeline_mode = #tpu.pipeline_mode<synchronous>, transform_indices = @transform_3, window_bounds = array<i64: 1, 32>}, {transform_indices = @transform_4, window_bounds = array<i64: 1, 128, 32>}]} {
    %c0 = arith.constant 0 : index
    %c0_0 = arith.constant 0 : index
    %c0_1 = arith.constant 0 : index
    %c0_2 = arith.constant 0 : index
    %0 = vector.load %arg1[%c0, %c0_0, %c0_1, %c0_2] : memref<1x10x18x5xf32, #tpu.memory_space<vmem>>, vector<1x10x18x5xf32>
    %1 = vector.shape_cast %0 : vector<1x10x18x5xf32> to vector<10x18x5xf32>
    %2 = vector.extract_strided_slice %1 {offsets = [0, 0, 0], sizes = [8, 16, 5], strides = [1, 1, 1]} : vector<10x18x5xf32> to vector<8x16x5xf32>
    %3 = vector.shape_cast %2 : vector<8x16x5xf32> to vector<128x5xf32>
    %c0_3 = arith.constant 0 : index
    %c0_4 = arith.constant 0 : index
    %4 = vector.load %arg6[%c0_3, %c0_4] : memref<128x45xf32, #tpu.memory_space<vmem>>, vector<128x5xf32>
    tpu.vector_store %arg6[%c0_3, %c0_4], %3 {strides = array<i32>} : memref<128x45xf32, #tpu.memory_space<vmem>>, vector<128x5xf32>,
    %5 = vector.extract_strided_slice %1 {offsets = [0, 1, 0], sizes = [8, 16, 5], strides = [1, 1, 1]} : vector<10x18x5xf32> to vector<8x16x5xf32>
    %6 = vector.shape_cast %5 : vector<8x16x5xf32> to vector<128x5xf32>
    %c0_5 = arith.constant 0 : index
    %c5 = arith.constant 5 : index
    %7 = vector.load %arg6[%c0_5, %c5] : memref<128x45xf32, #tpu.memory_space<vmem>>, vector<128x5xf32>
    tpu.vector_store %arg6[%c0_5, %c5], %6 {strides = array<i32>} : memref<128x45xf32, #tpu.memory_space<vmem>>, vector<128x5xf32>,
    %8 = vector.extract_strided_slice %1 {offsets = [0, 2, 0], sizes = [8, 16, 5], strides = [1, 1, 1]} : vector<10x18x5xf32> to vector<8x16x5xf32>
    %9 = vector.shape_cast %8 : vector<8x16x5xf32> to vector<128x5xf32>
    %c0_6 = arith.constant 0 : index
    %c10 = arith.constant 10 : index
    %10 = vector.load %arg6[%c0_6, %c10] : memref<128x45xf32, #tpu.memory_space<vmem>>, vector<128x5xf32>
    tpu.vector_store %arg6[%c0_6, %c10], %9 {strides = array<i32>} : memref<128x45xf32, #tpu.memory_space<vmem>>, vector<128x5xf32>,
    %11 = vector.extract_strided_slice %1 {offsets = [1, 0, 0], sizes = [8, 16, 5], strides = [1, 1, 1]} : vector<10x18x5xf32> to vector<8x16x5xf32>
    %12 = vector.shape_cast %11 : vector<8x16x5xf32> to vector<128x5xf32>
    %c0_7 = arith.constant 0 : index
    %c15 = arith.constant 15 : index
    %13 = vector.load %arg6[%c0_7, %c15] : memref<128x45xf32, #tpu.memory_space<vmem>>, vector<128x5xf32>
    tpu.vector_store %arg6[%c0_7, %c15], %12 {strides = array<i32>} : memref<128x45xf32, #tpu.memory_space<vmem>>, vector<128x5xf32>,
    %14 = vector.extract_strided_slice %1 {offsets = [1, 1, 0], sizes = [8, 16, 5], strides = [1, 1, 1]} : vector<10x18x5xf32> to vector<8x16x5xf32>
    %15 = vector.shape_cast %14 : vector<8x16x5xf32> to vector<128x5xf32>
    %c0_8 = arith.constant 0 : index
    %c20 = arith.constant 20 : index
    %16 = vector.load %arg6[%c0_8, %c20] : memref<128x45xf32, #tpu.memory_space<vmem>>, vector<128x5xf32>
    tpu.vector_store %arg6[%c0_8, %c20], %15 {strides = array<i32>} : memref<128x45xf32, #tpu.memory_space<vmem>>, vector<128x5xf32>,
    %17 = vector.extract_strided_slice %1 {offsets = [1, 2, 0], sizes = [8, 16, 5], strides = [1, 1, 1]} : vector<10x18x5xf32> to vector<8x16x5xf32>
    %18 = vector.shape_cast %17 : vector<8x16x5xf32> to vector<128x5xf32>
    %c0_9 = arith.constant 0 : index
    %c25 = arith.constant 25 : index
    %19 = vector.load %arg6[%c0_9, %c25] : memref<128x45xf32, #tpu.memory_space<vmem>>, vector<128x5xf32>
    tpu.vector_store %arg6[%c0_9, %c25], %18 {strides = array<i32>} : memref<128x45xf32, #tpu.memory_space<vmem>>, vector<128x5xf32>,
    %20 = vector.extract_strided_slice %1 {offsets = [2, 0, 0], sizes = [8, 16, 5], strides = [1, 1, 1]} : vector<10x18x5xf32> to vector<8x16x5xf32>
    %21 = vector.shape_cast %20 : vector<8x16x5xf32> to vector<128x5xf32>
    %c0_10 = arith.constant 0 : index
    %c30 = arith.constant 30 : index
    %22 = vector.load %arg6[%c0_10, %c30] : memref<128x45xf32, #tpu.memory_space<vmem>>, vector<128x5xf32>
    tpu.vector_store %arg6[%c0_10, %c30], %21 {strides = array<i32>} : memref<128x45xf32, #tpu.memory_space<vmem>>, vector<128x5xf32>,
    %23 = vector.extract_strided_slice %1 {offsets = [2, 1, 0], sizes = [8, 16, 5], strides = [1, 1, 1]} : vector<10x18x5xf32> to vector<8x16x5xf32>
    %24 = vector.shape_cast %23 : vector<8x16x5xf32> to vector<128x5xf32>
    %c0_11 = arith.constant 0 : index
    %c35 = arith.constant 35 : index
    %25 = vector.load %arg6[%c0_11, %c35] : memref<128x45xf32, #tpu.memory_space<vmem>>, vector<128x5xf32>
    tpu.vector_store %arg6[%c0_11, %c35], %24 {strides = array<i32>} : memref<128x45xf32, #tpu.memory_space<vmem>>, vector<128x5xf32>,
    %26 = vector.extract_strided_slice %1 {offsets = [2, 2, 0], sizes = [8, 16, 5], strides = [1, 1, 1]} : vector<10x18x5xf32> to vector<8x16x5xf32>
    %27 = vector.shape_cast %26 : vector<8x16x5xf32> to vector<128x5xf32>
    %c0_12 = arith.constant 0 : index
    %c40 = arith.constant 40 : index
    %28 = vector.load %arg6[%c0_12, %c40] : memref<128x45xf32, #tpu.memory_space<vmem>>, vector<128x5xf32>
    tpu.vector_store %arg6[%c0_12, %c40], %27 {strides = array<i32>} : memref<128x45xf32, #tpu.memory_space<vmem>>, vector<128x5xf32>,
    %c0_13 = arith.constant 0 : index
    %c0_14 = arith.constant 0 : index
    %29 = vector.load %arg6[%c0_13, %c0_14] : memref<128x45xf32, #tpu.memory_space<vmem>>, vector<128x45xf32>
    %c0_15 = arith.constant 0 : index
    %c0_16 = arith.constant 0 : index
    %30 = vector.load %arg2[%c0_15, %c0_16] : memref<45x32xf32, #tpu.memory_space<vmem>>, vector<45x32xf32>
    %cst = arith.constant dense<0.000000e+00> : vector<128x32xf32>
    %31 = tpu.matmul %29, %30, %cst {dimension_numbers = #tpu.dot_dimension_numbers<[1], [0], [0], [1], [0, 0, 1, 1], [], []>} : vector<128x45xf32>, vector<45x32xf32>, vector<128x32xf32> -> vector<128x32xf32>
    %c0_17 = arith.constant 0 : index
    %c0_18 = arith.constant 0 : index
    %32 = vector.load %arg3[%c0_17, %c0_18] : memref<1x32xf32, #tpu.memory_space<vmem>>, vector<1x32xf32>
    %33 = vector.broadcast %32 : vector<1x32xf32> to vector<128x32xf32>
    %34 = arith.mulf %31, %33 : vector<128x32xf32>
    %c0_19 = arith.constant 0 : index
    %c0_20 = arith.constant 0 : index
    %35 = vector.load %arg4[%c0_19, %c0_20] : memref<1x32xf32, #tpu.memory_space<vmem>>, vector<1x32xf32>
    %36 = vector.broadcast %35 : vector<1x32xf32> to vector<128x32xf32>
    %37 = arith.addf %34, %36 : vector<128x32xf32>
    %cst_21 = arith.constant 0.000000e+00 : f32
    %38 = vector.broadcast %cst_21 : f32 to vector<128x32xf32>
    %39 = arith.maximumf %37, %38 : vector<128x32xf32>
    %c0_22 = arith.constant 0 : index
    %c0_23 = arith.constant 0 : index
    %c0_24 = arith.constant 0 : index
    %40 = vector.load %arg5[%c0_22, %c0_23, %c0_24] : memref<1x128x32xf32, #tpu.memory_space<vmem>>, vector<1x128x32xf32>
    %41 = vector.shape_cast %40 : vector<1x128x32xf32> to vector<128x32xf32>
    %42 = vector.shape_cast %39 : vector<128x32xf32> to vector<1x128x32xf32>
    tpu.vector_store %arg5[%c0_22, %c0_23, %c0_24], %42 {strides = array<i32>} : memref<1x128x32xf32, #tpu.memory_space<vmem>>, vector<1x128x32xf32>,
    return
  }
  func.func @transform_0(%arg0: i32) -> (i32, i32, i32, i32) {
    %c0_i32 = arith.constant 0 : i32
    %c0_i32_0 = arith.constant 0 : i32
    %c0_i32_1 = arith.constant 0 : i32
    %c0_i32_2 = arith.constant 0 : i32
    return %arg0, %c0_i32, %c0_i32_0, %c0_i32_1 : i32, i32, i32, i32
  }
  func.func @transform_1(%arg0: i32) -> (i32, i32) {
    %c0_i32 = arith.constant 0 : i32
    %c0_i32_0 = arith.constant 0 : i32
    %c0_i32_1 = arith.constant 0 : i32
    return %c0_i32, %c0_i32_0 : i32, i32
  }
  func.func @transform_2(%arg0: i32) -> (i32, i32) {
    %c0_i32 = arith.constant 0 : i32
    %c0_i32_0 = arith.constant 0 : i32
    %c0_i32_1 = arith.constant 0 : i32
    return %c0_i32, %c0_i32_0 : i32, i32
  }
  func.func @transform_3(%arg0: i32) -> (i32, i32) {
    %c0_i32 = arith.constant 0 : i32
    %c0_i32_0 = arith.constant 0 : i32
    %c0_i32_1 = arith.constant 0 : i32
    return %c0_i32, %c0_i32_0 : i32, i32
  }
  func.func @transform_4(%arg0: i32) -> (i32, i32, i32) {
    %c0_i32 = arith.constant 0 : i32
    %c0_i32_0 = arith.constant 0 : i32
    %c0_i32_1 = arith.constant 0 : i32
    return %arg0, %c0_i32, %c0_i32_0 : i32, i32, i32
  }
}

</mosaic_0001>

<bundles_post_ra>
// kernel: tile.18
= control target key start
LH: loop header
LB: loop body
LE: loop exit
PB: predicated region body
PF: predicated region fallthrough
CT: control target
= control target key end

     0   :  { %s22_s0 = inlined_call_operand.vmem [shape: f32[8], index: 0, kind: input, shape index: {}]   ;;  %s23_s1 = inlined_call_operand.vmem [shape: f32[4,8], index: 1, kind: output, shape index: {}]  }
   0x1   :  { %v4_v0 = vld [vmem:[%s22_s0] ss:$0 sm:$0xff] }
   0x2   :  { %5 = vst [vmem:[%s23_s1] sm:$0xf] %v4_v0 }

// kernel: tile.19
= control target key start
LH: loop header
LB: loop body
LE: loop exit
PB: predicated region body
PF: predicated region fallthrough
CT: control target
= control target key end

     0   :  { %vm7_vm0 = vcmask 64512   ;;  %s37_s8 = smov 8   ;;  %s38_s9 = smov 16   ;;  %vm13_vm1 = vcmask 261312   ;;  %vm19_vm2 = vcmask 195712   ;;  %vm25_vm3 = vcmask 130112   ;;  %s55_s0 = inlined_call_operand.vmem [shape: f32[4,8], index: 0, kind: input, shape index: {}]   ;;  %s56_s1 = inlined_call_operand.vmem [shape: f32[1,32], index: 1, kind: output, shape index: {}]  }
   0x1   :  { %v4_v0 = vld [vmem:[%s55_s0] sm:$0xf]  ;;  %s36_s0 = smov 24  }
   0x2   :  { %5 = vst [vmem:[#allocation1] sm:$0xf] %v4_v0 }
   0x9   :  { %v10_v1 = vld [vmem:[#allocation1 + $0x3] sm:$0x1]   ;;  %v22_v2 = vld [vmem:[#allocation1 + $0x1] sm:$0x1]   ;;  %v6_v3 = vld [vmem:[#allocation1] sm:$0x1]  }
   0xa   :  { %11 = vrot.lane.b32.xlu0 %v10_v1, %s36_s0  ;;  %23 = vrot.lane.b32.xlu1 %v22_v2, %s37_s8  ;;  %v16_v4 = vld [vmem:[#allocation1 + $0x2] sm:$0x1]   ;;  %8 = vst.msk [vmem:[#allocation0] sm:$0x1] %vm7_vm0, %v6_v3  }
   0xe   :  { %17 = vrot.lane.b32.xlu0 %v16_v4, %s38_s9 }
  0x7c   :  { %v12_v5 = vpop.permute.xlu0 %11   ;;  %v24_v6 = vpop.permute.xlu1 %23  }
  0x7d   :  { %14 = vst.msk [vmem:[#allocation0] sm:$0x1] %vm13_vm1, %v12_v5  }
  0x80   :  { %v18_v7 = vpop.permute.xlu0 %17  }
  0x81   :  { %20 = vst.msk [vmem:[#allocation0] sm:$0x1] %vm19_vm2, %v18_v7  }
  0x82   :  { %26 = vst.msk [vmem:[#allocation0] sm:$0x1] %vm25_vm3, %v24_v6  }
  0x89   :  { %v30_v8 = vld [vmem:[#allocation0] sm:$0x1] }
  0x8a   :  { %32 = vst [vmem:[%s56_s1] sm:$0x1] %v30_v8 }

// kernel: blue_block.2
= control target key start
LH: loop header
LB: loop body
LE: loop exit
PB: predicated region body
PF: predicated region fallthrough
CT: control target
= control target key end

     0   :  { %s1638_s12 = smov 0   ;;  %s2156_s0 = inlined_call_operand.vmem [shape: f32[4,10,18,5], index: 0, kind: input, shape index: {}]   ;;  %s2157_s1 = inlined_call_operand.vmem [shape: f32[45,32], index: 1, kind: input, shape index: {}]   ;;  %s2158_s2 = inlined_call_operand.vmem [shape: f32[4,1,32], index: 2, kind: output, shape index: {0}]   ;;  %s2159_s3 = inlined_call_operand.vmem [shape: f32[4,1,32], index: 3, kind: output, shape index: {1}]  }
   0x1 LB: > { %s1326_s13 = sadd.s32 4294967295, %s1603_s12   ;;  %p1330_p0 = scmp.ge.s32.totalorder %s1603_s12, 1  ;;  %s1603_s12 = sphi %s1638_s12, %s14_s12  }
   0x2   : > { %p140_p1 = scmp.lt.s32.totalorder %s1603_s12, 5 }
   0x4   : > { %p141_p2 = pnand %p1330_p0, %p140_p1 }
   0x5   : > { %p165_p3 = scmp.lt.s32.totalorder (!%p141_p2), %s1326_s13, 3  ;;  %vm206_vm0 = vcmask (!%p141_p2), 39936   ;;  %vm353_vm1 = vcmask (!%p141_p2), 1045504   ;;  %s1605_s18 = smov (!%p141_p2), 15   ;;  %vm247_vm2 = vcmask (!%p141_p2), 1046528   ;;  %v891_v40 = vld [vmem:[%s2157_s1] sm:$0xff] (!%p141_p2) }
   0x6   : > { %144 = sbr.rel (%p141_p2) target bundleno = 827 (0x33b), region = 28  ;;  %s1606_s19 = smov (!%p141_p2), 10   ;;  %v892_v41 = vld [vmem:[%s2157_s1 + $0x8] sm:$0xff] (!%p141_p2)  ;;  %v893_v48 = vld [vmem:[%s2157_s1 + $0x10] sm:$0xff] (!%p141_p2)  ;;  %v894_v49 = vld [vmem:[%s2157_s1 + $0x18] sm:$0xff] (!%p141_p2)  ;;  %vm946_vm3 = vcmask (!%p141_p2), 1044480  }
   0x7   : > { %s1607_s20 = smov (!%p141_p2), 5   ;;  %s1608_s21 = smov (!%p141_p2), 20   ;;  %v1513_v43 = vpack.c.bf16 (!%p141_p2), %v892_v41, %v891_v40  ;;  %v1517_v51 = vpack.c.bf16 (!%p141_p2), %v894_v49, %v893_v48  ;;  %v895_v53 = vld [vmem:[%s2157_s1 + $0x20] sm:$0xff] (!%p141_p2)  ;;  %v896_v54 = vld [vmem:[%s2157_s1 + $0x28] sm:$0x1f] (!%p141_p2)  ;;  %vm1612_vm4 = vmmov (!%p141_p2), 1  }
   0x8   : > { %s1609_s22 = smov (!%p141_p2), 25   ;;  %s1610_s23 = smov (!%p141_p2), 30   ;;  %v1521_v56 = vpack.c.bf16 (!%p141_p2), %v896_v54, %v895_v53  ;;  %vm1522_vm5 = vmpackc.low (!%p141_p2), %vm946_vm3, %vm1612_vm4  ;;  %vm336_vm6 = vcmask (!%p141_p2), 80936   ;;  %vm442_vm7 = vcmask (!%p141_p2), 121936   ;;  %vm509_vm8 = vcmask (!%p141_p2), 162936  }
   0x9   : > { %1514 = vmatprep.subr.bf16.mxu0 (!%p141_p2), %v1513_v43  ;;  %s1611_s28 = smov (!%p141_p2), 35   ;;  %s1613_s10 = smov (!%p141_p2), 40   ;;  %vm580_vm9 = vcmask (!%p141_p2), 203936   ;;  %vm650_vm10 = vcmask (!%p141_p2), 244936   ;;  %vm717_vm11 = vcmask (!%p141_p2), 285936   ;;  %vm788_vm12 = vcmask (!%p141_p2), 326936  }
   0xa   : > { %1516 = vmatpush3.bf16.msra.mxu0 (!%p141_p2), %v1513_v43  ;;  %vm858_vm13 = vcmask (!%p141_p2), 367936   ;;  %vm897_vm14 = vcmask (!%p141_p2), 367616   ;;  %vm1615_vm15 = vmmov (!%p141_p2), 0  }
   0xb   : > { %1518 = vmatprep.subr.bf16.mxu0 (!%p141_p2), %v1517_v51 }
   0xd   : > { %s2161_s13 = smov (!%p165_p3, %s1326_s13), 3 }
   0xe   : > { %s1575_s14 = smul.u32 240, %s2161_s13  ;;  %1520 = vmatpush3.bf16.msra.mxu0 %v1517_v51  ;;  %s172_s15 = scalar_lea.vmem %s2158_s2, %s2161_s13 }
   0xf   : > { %1523 = vmatprep.subr.msk.bf16.mxu0 %vm1522_vm5, %v1521_v56 }
  0x10   : > { %s1652_s17 = scalar_lea.vmem %s2156_s0, %s1575_s14 }
  0x11   : > { %v1655_v0 = vld [vmem:[%s1652_s17 + $0x20] sm:$0xff]  ;;  %v179_v1 = vld [vmem:[%s1652_s17 + $0x18] sm:$0xff]  ;;  %v177_v3 = vld [vmem:[%s1652_s17 + $0x8] sm:$0xff] }
  0x12   : > { %v176_v2 = vld [vmem:[%s1652_s17] sm:$0xff]  ;;  %463 = vrot.lane.b32.xlu1 %v1655_v0, %s1605_s18  ;;  %461 = vrot.lane.b32.xlu0 %v179_v1, %s1605_s18  ;;  %v178_v6 = vld [vmem:[%s1652_s17 + $0x10] sm:$0x3]  ;;  %209 = vst.msk [vmem:[#allocation2 + $0x10] sm:$0xff] %vm206_vm0, %v179_v1  ;;  %210 = vst.msk [vmem:[#allocation2 + $0x18] sm:$0xff] %vm206_vm0, %v1655_v0  ;;  %v355_v7 = vrot.slane %v177_v3, 2 }
  0x13   : > { %v354_v4 = vrot.slane %v176_v2, 2  ;;  %v248_v5 = vrot.slane %v176_v2, 1  ;;  %207 = vst.msk [vmem:[#allocation2] sm:$0xff] %vm206_vm0, %v176_v2  ;;  %v249_v8 = vrot.slane %v177_v3, 1  ;;  %v357_v9 = vrot.slane %v178_v6, 2  ;;  %208 = vst.msk [vmem:[#allocation2 + $0x8] sm:$0xff] %vm206_vm0, %v177_v3  ;;  %1526 = vmatpush3.bf16.msk.msra.mxu0 %vm1522_vm5, %v1521_v56 }
  0x14   : > { %v251_v10 = vrot.slane %v178_v6, 1  ;;  %v1670_v11 = vld [vmem:[%s1652_s17 + $0x30] sm:$0xff]  ;;  %v1673_v12 = vld [vmem:[%s1652_s17 + $0x38] sm:$0xff]  ;;  %v1678_v15 = vld [vmem:[%s1652_s17 + $0x48] sm:$0xff]  ;;  %v253_v20 = vrot.slane %v179_v1, 1  ;;  %v254_v21 = vrot.slane %v1655_v0, 1 }
  0x15   : > { %v356_v13 = vsel %vm353_vm1, %v354_v4, %v355_v7  ;;  %v250_v14 = vsel %vm247_vm2, %v248_v5, %v249_v8  ;;  %v1681_v16 = vld [vmem:[%s1652_s17 + $0x50] sm:$0xff]  ;;  %211 = vst.msk [vmem:[#allocation2 + $0x20] sm:$0xff] %vm206_vm0, %v1670_v11  ;;  %212 = vst.msk [vmem:[#allocation2 + $0x28] sm:$0xff] %vm206_vm0, %v1673_v12  ;;  %v1690_v17 = vld [vmem:[%s1652_s17 + $0x60] sm:$0xff]  ;;  %v358_v18 = vsel %vm353_vm1, %v355_v7, %v357_v9  ;;  %v369_v26 = vrot.slane %v1678_v15, 2 }
  0x16   : > { %394 = vrot.lane.b32.xlu1 %v356_v13, %s1606_s19  ;;  %288 = vrot.lane.b32.xlu0 %v250_v14, %s1607_s20  ;;  %213 = vst.msk [vmem:[#allocation2 + $0x30] sm:$0xff] %vm206_vm0, %v1678_v15  ;;  %214 = vst.msk [vmem:[#allocation2 + $0x38] sm:$0xff] %vm206_vm0, %v1681_v16  ;;  %v252_v19 = vsel %vm247_vm2, %v249_v8, %v251_v10  ;;  %v1700_v22 = vld [vmem:[%s1652_s17 + $0x68] sm:$0xff]  ;;  %v1705_v23 = vld [vmem:[%s1652_s17 + $0x78] sm:$0xff]  ;;  %v370_v27 = vrot.slane %v1681_v16, 2  ;;  %v255_v28 = vsel %vm247_vm2, %v253_v20, %v254_v21 }
  0x17   : > { %215 = vst.msk [vmem:[#allocation2 + $0x40] sm:$0xff] %vm206_vm0, %v1690_v17  ;;  %v181_v24 = vld [vmem:[%s1652_s17 + $0x28] sm:$0x3]  ;;  %216 = vst.msk [vmem:[#allocation2 + $0x48] sm:$0xff] %vm206_vm0, %v1700_v22  ;;  %v1713_v25 = vld [vmem:[%s1652_s17 + $0x80] sm:$0xff]  ;;  %v359_v29 = vrot.slane %v179_v1, 2 }
  0x18   : > { %217 = vst.msk [vmem:[#allocation2 + $0x50] sm:$0xff] %vm206_vm0, %v1705_v23  ;;  %218 = vst.msk [vmem:[#allocation2 + $0x58] sm:$0xff] %vm206_vm0, %v1713_v25  ;;  %v360_v30 = vrot.slane %v1655_v0, 2  ;;  %v256_v31 = vrot.slane %v181_v24, 1  ;;  %v1726_v32 = vsel %vm353_vm1, %v369_v26, %v370_v27  ;;  %v362_v35 = vrot.slane %v181_v24, 2  ;;  %v1738_v37 = vld [vmem:[%s1652_s17 + $0x90] sm:$0xff] }
  0x19   : > { %219 = vst.msk [vmem:[#allocation2 + $0x60] sm:$0xff] %vm206_vm0, %v1738_v37  ;;  %v258_v38 = vrot.slane %v1670_v11, 1  ;;  %v259_v39 = vrot.slane %v1673_v12, 1  ;;  %v1758_v44 = vld [vmem:[%s1652_s17 + $0x98] sm:$0xff]  ;;  %v184_v45 = vld [vmem:[%s1652_s17 + $0x40] sm:$0x3] }
  0x1a   : > { %396 = vrot.lane.b32.xlu1 %v358_v18, %s1606_s19  ;;  %290 = vrot.lane.b32.xlu0 %v252_v19, %s1607_s20  ;;  %v361_v33 = vsel %vm353_vm1, %v359_v29, %v360_v30  ;;  %v257_v34 = vsel %vm247_vm2, %v254_v21, %v256_v31  ;;  %v363_v36 = vsel %vm353_vm1, %v360_v30, %v362_v35  ;;  %v364_v46 = vrot.slane %v1670_v11, 2  ;;  %v1795_v59 = vld [vmem:[%s1652_s17 + $0xa8] sm:$0xff]  ;;  %v1808_v62 = vld [vmem:[%s1652_s17 + $0xb0] sm:$0xff] }
  0x1b   : > { %v260_v42 = vsel %vm247_vm2, %v258_v38, %v259_v39  ;;  %220 = vst.msk [vmem:[#allocation2 + $0x68] sm:$0xff] %vm206_vm0, %v1758_v44  ;;  %v365_v47 = vrot.slane %v1673_v12, 2  ;;  %v261_v50 = vrot.slane %v184_v45, 1  ;;  %v367_v57 = vrot.slane %v184_v45, 2  ;;  %221 = vst.msk [vmem:[#allocation2 + $0x70] sm:$0xff] %vm206_vm0, %v1795_v59 }
  0x1c   : > { %v263_v60 = vrot.slane %v1678_v15, 1  ;;  %v264_v61 = vrot.slane %v1681_v16, 1  ;;  %222 = vst.msk [vmem:[#allocation2 + $0x78] sm:$0xff] %vm206_vm0, %v1808_v62  ;;  %v187_v0 = vld [vmem:[%s1652_s17 + $0x58] sm:$0x3]  ;;  %v268_v5 = vrot.slane %v1690_v17, 1 }
  0x1d   : > { %v366_v52 = vsel %vm353_vm1, %v364_v46, %v365_v47  ;;  %v262_v55 = vsel %vm247_vm2, %v259_v39, %v261_v50  ;;  %v368_v58 = vsel %vm353_vm1, %v365_v47, %v367_v57  ;;  %v266_v1 = vrot.slane %v187_v0, 1  ;;  %v190_v8 = vld [vmem:[%s1652_s17 + $0x70] sm:$0x3]  ;;  %v193_v29 = vld [vmem:[%s1652_s17 + $0x88] sm:$0x3] }
  0x1e   : > { %292 = vrot.lane.b32.xlu1 %v255_v28, %s1607_s20  ;;  %532 = vrot.lane.b32.xlu0 %v255_v28, %s1608_s21  ;;  %v265_v63 = vsel %vm247_vm2, %v263_v60, %v264_v61  ;;  %v372_v3 = vrot.slane %v187_v0, 2  ;;  %v269_v6 = vrot.slane %v1700_v22, 1  ;;  %v374_v9 = vrot.slane %v1690_v17, 2  ;;  %v196_v56 = vld [vmem:[%s1652_s17 + $0xa0] sm:$0x3] }
  0x1f   : > { %v267_v2 = vsel %vm247_vm2, %v264_v61, %v266_v1  ;;  %v375_v10 = vrot.slane %v1700_v22, 2  ;;  %v377_v14 = vrot.slane %v190_v8, 2  ;;  %v273_v20 = vrot.slane %v1705_v23, 1 }
  0x20   : > { %v373_v4 = vsel %vm353_vm1, %v370_v27, %v372_v3  ;;  %v270_v7 = vsel %vm247_vm2, %v268_v5, %v269_v6  ;;  %v274_v21 = vrot.slane %v1713_v25, 1  ;;  %v379_v30 = vrot.slane %v1705_v23, 2 }
  0x21   : > { %v380_v31 = vrot.slane %v1713_v25, 2  ;;  %v382_v39 = vrot.slane %v193_v29, 2  ;;  %v278_v49 = vrot.slane %v1738_v37, 1  ;;  %v279_v50 = vrot.slane %v1758_v44, 1 }
  0x22   : > { %602 = vrot.lane.b32.xlu1 %v361_v33, %s1609_s22  ;;  %534 = vrot.lane.b32.xlu0 %v257_v34, %s1608_s21  ;;  %v275_v26 = vsel %vm247_vm2, %v273_v20, %v274_v21  ;;  %v384_v57 = vrot.slane %v1738_v37, 2  ;;  %v281_v60 = vrot.slane %v196_v56, 1  ;;  %vm1165_vm0 = vcmask 253952  }
  0x23   : > { %v381_v35 = vsel %vm353_vm1, %v379_v30, %v380_v31  ;;  %v280_v53 = vsel %vm247_vm2, %v278_v49, %v279_v50 }
  0x26   : > { %398 = vrot.lane.b32.xlu1 %v361_v33, %s1606_s19  ;;  %294 = vrot.lane.b32.xlu0 %v257_v34, %s1607_s20 }
  0x2a   : > { %669 = vrot.lane.b32.xlu1 %v1670_v11, %s1610_s23  ;;  %604 = vrot.lane.b32.xlu0 %v363_v36, %s1609_s22 }
  0x2e   : > { %465 = vrot.lane.b32.xlu1 %v1670_v11, %s1605_s18  ;;  %400 = vrot.lane.b32.xlu0 %v363_v36, %s1606_s19  ;;  %v271_v11 = vrot.slane %v190_v8, 1 }
  0x30   : > { %v272_v13 = vsel %vm247_vm2, %v269_v6, %v271_v11 }
  0x32   : > { %740 = vrot.lane.b32.xlu1 %v260_v42, %s1611_s28  ;;  %671 = vrot.lane.b32.xlu0 %v1673_v12, %s1610_s23 }
  0x36   : > { %536 = vrot.lane.b32.xlu1 %v260_v42, %s1608_s21  ;;  %467 = vrot.lane.b32.xlu0 %v1673_v12, %s1605_s18  ;;  %v376_v12 = vsel %vm353_vm1, %v374_v9, %v375_v10 }
  0x3a   : > { %810 = vrot.lane.b32.xlu1 %v366_v52, %s1613_s10  ;;  %742 = vrot.lane.b32.xlu0 %v262_v55, %s1611_s28 }
  0x3e   : > { %538 = vrot.lane.b32.xlu1 %v262_v55, %s1608_s21  ;;  %296 = vrot.lane.b32.xlu0 %v260_v42, %s1607_s20 }
  0x42   : > { %812 = vrot.lane.b32.xlu1 %v368_v58, %s1613_s10  ;;  %606 = vrot.lane.b32.xlu0 %v366_v52, %s1609_s22 }
  0x46   : > { %402 = vrot.lane.b32.xlu1 %v366_v52, %s1606_s19  ;;  %298 = vrot.lane.b32.xlu0 %v262_v55, %s1607_s20 }
  0x4a   : > { %673 = vrot.lane.b32.xlu1 %v1678_v15, %s1610_s23  ;;  %608 = vrot.lane.b32.xlu0 %v368_v58, %s1609_s22 }
  0x4e   : > { %469 = vrot.lane.b32.xlu1 %v1678_v15, %s1605_s18  ;;  %404 = vrot.lane.b32.xlu0 %v368_v58, %s1606_s19  ;;  %v378_v15 = vsel %vm353_vm1, %v375_v10, %v377_v14  ;;  %v385_v58 = vrot.slane %v1758_v44, 2  ;;  %v283_v14 = vrot.slane %v1795_v59, 1 }
  0x50   : > { %v386_v1 = vsel %vm353_vm1, %v384_v57, %v385_v58 }
  0x52   : > { %744 = vrot.lane.b32.xlu1 %v265_v63, %s1611_s28  ;;  %675 = vrot.lane.b32.xlu0 %v1681_v16, %s1610_s23 }
  0x56   : > { %540 = vrot.lane.b32.xlu1 %v265_v63, %s1608_s21  ;;  %471 = vrot.lane.b32.xlu0 %v1681_v16, %s1605_s18 }
  0x5a   : > { %814 = vrot.lane.b32.xlu1 %v1726_v32, %s1613_s10  ;;  %746 = vrot.lane.b32.xlu0 %v267_v2, %s1611_s28 }
  0x5e   : > { %542 = vrot.lane.b32.xlu1 %v267_v2, %s1608_s21  ;;  %300 = vrot.lane.b32.xlu0 %v265_v63, %s1607_s20 }
  0x62   : > { %816 = vrot.lane.b32.xlu1 %v373_v4, %s1613_s10  ;;  %610 = vrot.lane.b32.xlu0 %v1726_v32, %s1609_s22 }
  0x66   : > { %406 = vrot.lane.b32.xlu1 %v1726_v32, %s1606_s19  ;;  %302 = vrot.lane.b32.xlu0 %v267_v2, %s1607_s20  ;;  %v276_v32 = vrot.slane %v193_v29, 1 }
  0x68   : > { %v277_v36 = vsel %vm247_vm2, %v274_v21, %v276_v32  ;;  %v199_v21 = vld [vmem:[%s1652_s17 + $0xb8] sm:$0x3] }
  0x6a   : > { %677 = vrot.lane.b32.xlu1 %v1690_v17, %s1610_s23  ;;  %612 = vrot.lane.b32.xlu0 %v373_v4, %s1609_s22 }
  0x6e   : > { %473 = vrot.lane.b32.xlu1 %v1690_v17, %s1605_s18  ;;  %408 = vrot.lane.b32.xlu0 %v373_v4, %s1606_s19  ;;  %v387_v4 = vrot.slane %v196_v56, 2 }
  0x72   : > { %748 = vrot.lane.b32.xlu1 %v270_v7, %s1611_s28  ;;  %679 = vrot.lane.b32.xlu0 %v1700_v22, %s1610_s23 }
  0x76   : > { %544 = vrot.lane.b32.xlu1 %v270_v7, %s1608_s21  ;;  %475 = vrot.lane.b32.xlu0 %v1700_v22, %s1605_s18 }
  0x7a   : > { %818 = vrot.lane.b32.xlu1 %v376_v12, %s1613_s10  ;;  %750 = vrot.lane.b32.xlu0 %v272_v13, %s1611_s28 }
  0x7e   : > { %546 = vrot.lane.b32.xlu1 %v272_v13, %s1608_s21  ;;  %304 = vrot.lane.b32.xlu0 %v270_v7, %s1607_s20 }
  0x82   : > { %820 = vrot.lane.b32.xlu1 %v378_v15, %s1613_s10  ;;  %614 = vrot.lane.b32.xlu0 %v376_v12, %s1609_s22 }
  0x84   : > { %v464_v16 = vpop.permute.xlu1 %463  ;;  %v462_v17 = vpop.permute.xlu0 %461 }
  0x86   : > { %410 = vrot.lane.b32.xlu1 %v376_v12, %s1606_s19  ;;  %306 = vrot.lane.b32.xlu0 %v272_v13, %s1607_s20 }
  0x88   : > { %v395_v18 = vpop.permute.xlu1 %394  ;;  %v289_v19 = vpop.permute.xlu0 %288 }
  0x89   : > { %337 = vst.msk [vmem:[#allocation2] sm:$0xff] %vm336_vm6, %v289_v19 }
  0x8a   : > { %443 = vst.msk [vmem:[#allocation2] sm:$0xff] %vm442_vm7, %v395_v18  ;;  %681 = vrot.lane.b32.xlu1 %v1705_v23, %s1610_s23  ;;  %616 = vrot.lane.b32.xlu0 %v378_v15, %s1609_s22 }
  0x8b   : > { %510 = vst.msk [vmem:[#allocation2] sm:$0xff] %vm509_vm8, %v462_v17 }
  0x8c   : > { %v397_v22 = vpop.permute.xlu1 %396  ;;  %v291_v24 = vpop.permute.xlu0 %290 }
  0x8d   : > { %338 = vst.msk [vmem:[#allocation2 + $0x8] sm:$0xff] %vm336_vm6, %v291_v24  ;;  %v390_v24 = vrot.slane %v1808_v62, 2 }
  0x8e   : > { %444 = vst.msk [vmem:[#allocation2 + $0x8] sm:$0xff] %vm442_vm7, %v397_v22  ;;  %477 = vrot.lane.b32.xlu1 %v1705_v23, %s1605_s18  ;;  %412 = vrot.lane.b32.xlu0 %v378_v15, %s1606_s19  ;;  %v284_v15 = vrot.slane %v1808_v62, 1  ;;  %v389_v22 = vrot.slane %v1795_v59, 2 }
  0x8f   : > { %511 = vst.msk [vmem:[#allocation2 + $0x8] sm:$0xff] %vm509_vm8, %v464_v16 }
  0x90   : > { %v293_v27 = vpop.permute.xlu1 %292  ;;  %v533_v28 = vpop.permute.xlu0 %532  ;;  %v285_v18 = vsel %vm247_vm2, %v283_v14, %v284_v15  ;;  %v391_v30 = vsel %vm353_vm1, %v389_v22, %v390_v24 }
  0x91   : > { %339 = vst.msk [vmem:[#allocation2 + $0x10] sm:$0xff] %vm336_vm6, %v293_v27 }
  0x92   : > { %581 = vst.msk [vmem:[#allocation2] sm:$0xff] %vm580_vm9, %v533_v28  ;;  %752 = vrot.lane.b32.xlu1 %v275_v26, %s1611_s28  ;;  %683 = vrot.lane.b32.xlu0 %v1713_v25, %s1610_s23 }
  0x94   : > { %v603_v33 = vpop.permute.xlu1 %602  ;;  %v535_v34 = vpop.permute.xlu0 %534 }
  0x95   : > { %651 = vst.msk [vmem:[#allocation2] sm:$0xff] %vm650_vm10, %v603_v33  ;;  %v392_v33 = vrot.slane %v199_v21, 2 }
  0x96   : > { %582 = vst.msk [vmem:[#allocation2 + $0x8] sm:$0xff] %vm580_vm9, %v535_v34  ;;  %548 = vrot.lane.b32.xlu1 %v275_v26, %s1608_s21  ;;  %479 = vrot.lane.b32.xlu0 %v1713_v25, %s1605_s18  ;;  %v383_v25 = vsel %vm353_vm1, %v380_v31, %v382_v39 }
  0x98   : > { %v399_v38 = vpop.permute.xlu1 %398  ;;  %v295_v23 = vpop.permute.xlu0 %294 }
  0x99   : > { %445 = vst.msk [vmem:[#allocation2 + $0x10] sm:$0xff] %vm442_vm7, %v399_v38 }
  0x9a   : > { %340 = vst.msk [vmem:[#allocation2 + $0x18] sm:$0xff] %vm336_vm6, %v295_v23  ;;  %822 = vrot.lane.b32.xlu1 %v381_v35, %s1613_s10  ;;  %754 = vrot.lane.b32.xlu0 %v277_v36, %s1611_s28 }
  0x9c   : > { %v670_v40 = vpop.permute.xlu1 %669  ;;  %v605_v41 = vpop.permute.xlu0 %604 }
  0x9d   : > { %718 = vst.msk [vmem:[#allocation2] sm:$0xff] %vm717_vm11, %v670_v40 }
  0x9e   : > { %652 = vst.msk [vmem:[#allocation2 + $0x8] sm:$0xff] %vm650_vm10, %v605_v41  ;;  %550 = vrot.lane.b32.xlu1 %v277_v36, %s1608_s21  ;;  %308 = vrot.lane.b32.xlu0 %v275_v26, %s1607_s20  ;;  %v286_v26 = vrot.slane %v199_v21, 1  ;;  %v200_v41 = vld [vmem:[%s1652_s17 + $0xc0] sm:$0xff] }
  0xa0   : > { %v466_v42 = vpop.permute.xlu1 %465  ;;  %v401_v43 = vpop.permute.xlu0 %400 }
  0xa1   : > { %512 = vst.msk [vmem:[#allocation2 + $0x10] sm:$0xff] %vm509_vm8, %v466_v42 }
  0xa2   : > { %446 = vst.msk [vmem:[#allocation2 + $0x18] sm:$0xff] %vm442_vm7, %v401_v43  ;;  %824 = vrot.lane.b32.xlu1 %v383_v25, %s1613_s10  ;;  %618 = vrot.lane.b32.xlu0 %v381_v35, %s1609_s22  ;;  %v201_v43 = vld [vmem:[%s1652_s17 + $0xc8] sm:$0xff] }
  0xa4   : > { %v741_v45 = vpop.permute.xlu1 %740  ;;  %v672_v46 = vpop.permute.xlu0 %671 }
  0xa5   : > { %789 = vst.msk [vmem:[#allocation2] sm:$0xff] %vm788_vm12, %v741_v45  ;;  %v527_v45 = vrot.slane %v200_v41, 1 }
  0xa6   : > { %719 = vst.msk [vmem:[#allocation2 + $0x8] sm:$0xff] %vm717_vm11, %v672_v46  ;;  %414 = vrot.lane.b32.xlu1 %v381_v35, %s1606_s19  ;;  %310 = vrot.lane.b32.xlu0 %v277_v36, %s1607_s20  ;;  %v528_v46 = vrot.slane %v201_v43, 1 }
  0xa8   : > { %v537_v47 = vpop.permute.xlu1 %536  ;;  %v468_v48 = vpop.permute.xlu0 %467  ;;  %v529_v49 = vsel %vm247_vm2, %v527_v45, %v528_v46 }
  0xa9   : > { %583 = vst.msk [vmem:[#allocation2 + $0x10] sm:$0xff] %vm580_vm9, %v537_v47 }
  0xaa   : > { %513 = vst.msk [vmem:[#allocation2 + $0x18] sm:$0xff] %vm509_vm8, %v468_v48  ;;  %685 = vrot.lane.b32.xlu1 %v1738_v37, %s1610_s23  ;;  %620 = vrot.lane.b32.xlu0 %v383_v25, %s1609_s22 }
  0xac   : > { %v811_v51 = vpop.permute.xlu1 %810  ;;  %v743_v52 = vpop.permute.xlu0 %742 }
  0xad   : > { %859 = vst.msk [vmem:[#allocation2] sm:$0xff] %vm858_vm13, %v811_v51 }
  0xae   : > { %790 = vst.msk [vmem:[#allocation2 + $0x8] sm:$0xff] %vm788_vm12, %v743_v52  ;;  %481 = vrot.lane.b32.xlu1 %v1738_v37, %s1605_s18  ;;  %416 = vrot.lane.b32.xlu0 %v383_v25, %s1606_s19  ;;  %v282_v37 = vsel %vm247_vm2, %v279_v50, %v281_v60  ;;  %v202_v52 = vld [vmem:[%s1652_s17 + $0xd0] sm:$0x3] }
  0xb0   : > { %v539_v54 = vpop.permute.xlu1 %538  ;;  %v297_v55 = vpop.permute.xlu0 %296 }
  0xb1   : > { %584 = vst.msk [vmem:[#allocation2 + $0x18] sm:$0xff] %vm580_vm9, %v539_v54  ;;  %v598_v54 = vrot.slane %v201_v43, 2 }
  0xb2   : > { %341 = vst.msk [vmem:[#allocation2 + $0x20] sm:$0xff] %vm336_vm6, %v297_v55  ;;  %756 = vrot.lane.b32.xlu1 %v280_v53, %s1611_s28  ;;  %687 = vrot.lane.b32.xlu0 %v1758_v44, %s1610_s23  ;;  %v530_v55 = vrot.slane %v202_v52, 1 }
  0xb4   : > { %v813_v61 = vpop.permute.xlu1 %812  ;;  %v607_v63 = vpop.permute.xlu0 %606  ;;  %v875_v0 = vld [vmem:[#allocation2] sm:$0xff]  ;;  %v531_v60 = vsel %vm247_vm2, %v528_v46, %v530_v55 }
  0xb5   : > { %860 = vst.msk [vmem:[#allocation2 + $0x8] sm:$0xff] %vm858_vm13, %v813_v61  ;;  %1419 = vmatprep.mubr.msk.f32.mxu0 %vm897_vm14, %v875_v0 }
  0xb6   : > { %653 = vst.msk [vmem:[#allocation2 + $0x10] sm:$0xff] %vm650_vm10, %v607_v63  ;;  %552 = vrot.lane.b32.xlu1 %v280_v53, %s1608_s21  ;;  %483 = vrot.lane.b32.xlu0 %v1758_v44, %s1605_s18  ;;  %v388_v44 = vsel %vm353_vm1, %v385_v58, %v387_v4 }
  0xb8   : > { %v403_v2 = vpop.permute.xlu1 %402  ;;  %v299_v3 = vpop.permute.xlu0 %298 }
  0xb9   : > { %447 = vst.msk [vmem:[#allocation2 + $0x20] sm:$0xff] %vm442_vm7, %v403_v2 }
  0xba   : > { %342 = vst.msk [vmem:[#allocation2 + $0x28] sm:$0xff] %vm336_vm6, %v299_v3  ;;  %826 = vrot.lane.b32.xlu1 %v386_v1, %s1613_s10  ;;  %758 = vrot.lane.b32.xlu0 %v282_v37, %s1611_s28 }
  0xbc   : > { %v674_v5 = vpop.permute.xlu1 %673  ;;  %v609_v6 = vpop.permute.xlu0 %608  ;;  %v876_v7 = vld [vmem:[#allocation2 + $0x8] sm:$0xff] }
  0xbd   : > { %720 = vst.msk [vmem:[#allocation2 + $0x10] sm:$0xff] %vm717_vm11, %v674_v5  ;;  %1420 = vmatmul.mubr.msk.f32.vlgmr.msra.gmra.mrb[0].mxu0 %vm897_vm14, %v876_v7  ;;  %v203_v7 = vld [vmem:[%s1652_s17 + $0xd8] sm:$0xff] }
  0xbe   : > { %654 = vst.msk [vmem:[#allocation2 + $0x18] sm:$0xff] %vm650_vm10, %v609_v6  ;;  %554 = vrot.lane.b32.xlu1 %v282_v37, %s1608_s21  ;;  %312 = vrot.lane.b32.xlu0 %v280_v53, %s1607_s20  ;;  %v597_v53 = vrot.slane %v200_v41, 2  ;;  %v805_v14 = vrot.slane %v203_v7, 2 }
  0xc0   : > { %v470_v8 = vpop.permute.xlu1 %469  ;;  %v405_v9 = vpop.permute.xlu0 %404  ;;  %v599_v61 = vsel %vm353_vm1, %v597_v53, %v598_v54 }
  0xc1   : > { %514 = vst.msk [vmem:[#allocation2 + $0x20] sm:$0xff] %vm509_vm8, %v470_v8  ;;  %v205_v8 = vld [vmem:[%s1652_s17 + $0xe8] sm:$0x3] }
  0xc2   : > { %448 = vst.msk [vmem:[#allocation2 + $0x28] sm:$0xff] %vm442_vm7, %v405_v9  ;;  %828 = vrot.lane.b32.xlu1 %v388_v44, %s1613_s10  ;;  %622 = vrot.lane.b32.xlu0 %v386_v1, %s1609_s22  ;;  %v735_v9 = vrot.slane %v203_v7, 1 }
  0xc4   : > { %v745_v10 = vpop.permute.xlu1 %744  ;;  %v676_v11 = vpop.permute.xlu0 %675 }
  0xc5   : > { %791 = vst.msk [vmem:[#allocation2 + $0x10] sm:$0xff] %vm788_vm12, %v745_v10 }
  0xc6   : > { %721 = vst.msk [vmem:[#allocation2 + $0x18] sm:$0xff] %vm717_vm11, %v676_v11  ;;  %418 = vrot.lane.b32.xlu1 %v386_v1, %s1606_s19  ;;  %314 = vrot.lane.b32.xlu0 %v282_v37, %s1607_s20  ;;  %v600_v1 = vrot.slane %v202_v52, 2  ;;  %v738_v11 = vrot.slane %v205_v8, 1 }
  0xc8   : > { %v541_v12 = vpop.permute.xlu1 %540  ;;  %v472_v13 = vpop.permute.xlu0 %471  ;;  %v601_v4 = vsel %vm353_vm1, %v598_v54, %v600_v1 }
  0xc9   : > { %585 = vst.msk [vmem:[#allocation2 + $0x20] sm:$0xff] %vm580_vm9, %v541_v12 }
  0xca   : > { %515 = vst.msk [vmem:[#allocation2 + $0x28] sm:$0xff] %vm509_vm8, %v472_v13  ;;  %689 = vrot.lane.b32.xlu1 %v1795_v59, %s1610_s23  ;;  %624 = vrot.lane.b32.xlu0 %v388_v44, %s1609_s22 }
  0xcc   : > { %v815_v16 = vpop.permute.xlu1 %814  ;;  %v747_v17 = vpop.permute.xlu0 %746 }
  0xcd   : > { %861 = vst.msk [vmem:[#allocation2 + $0x10] sm:$0xff] %vm858_vm13, %v815_v16 }
  0xce   : > { %792 = vst.msk [vmem:[#allocation2 + $0x18] sm:$0xff] %vm788_vm12, %v747_v17  ;;  %485 = vrot.lane.b32.xlu1 %v1795_v59, %s1605_s18  ;;  %420 = vrot.lane.b32.xlu0 %v388_v44, %s1606_s19  ;;  %v287_v59 = vsel %vm247_vm2, %v284_v15, %v286_v26  ;;  %v204_v44 = vld [vmem:[%s1652_s17 + $0xe0] sm:$0xff] }
  0xcf   : > { %v736_v10 = vrot.slane %v204_v44, 1  ;;  %v806_v15 = vrot.slane %v204_v44, 2 }
  0xd0   : > { %v543_v19 = vpop.permute.xlu1 %542  ;;  %v301_v20 = vpop.permute.xlu0 %300 }
  0xd1   : > { %586 = vst.msk [vmem:[#allocation2 + $0x28] sm:$0xff] %vm580_vm9, %v543_v19  ;;  %v737_v16 = vsel %vm247_vm2, %v735_v9, %v736_v10  ;;  %v739_v17 = vsel %vm247_vm2, %v736_v10, %v738_v11  ;;  %v807_v21 = vsel %vm353_vm1, %v805_v14, %v806_v15 }
  0xd2   : > { %343 = vst.msk [vmem:[#allocation2 + $0x30] sm:$0xff] %vm336_vm6, %v301_v20  ;;  %760 = vrot.lane.b32.xlu1 %v285_v18, %s1611_s28  ;;  %691 = vrot.lane.b32.xlu0 %v1808_v62, %s1610_s23 }
  0xd4   : > { %v817_v27 = vpop.permute.xlu1 %816  ;;  %v611_v28 = vpop.permute.xlu0 %610  ;;  %v877_v29 = vld [vmem:[#allocation2 + $0x10] sm:$0xff] }
  0xd5   : > { %862 = vst.msk [vmem:[#allocation2 + $0x18] sm:$0xff] %vm858_vm13, %v817_v27  ;;  %1422 = vmatprep.mubr.msk.f32.mxu0 %vm897_vm14, %v877_v29  ;;  %v1614_v29 = vmov 0.0|0.0  }
  0xd6   : > { %655 = vst.msk [vmem:[#allocation2 + $0x20] sm:$0xff] %vm650_vm10, %v611_v28  ;;  %556 = vrot.lane.b32.xlu1 %v285_v18, %s1608_s21  ;;  %487 = vrot.lane.b32.xlu0 %v1808_v62, %s1605_s18  ;;  %v393_v62 = vsel %vm353_vm1, %v390_v24, %v392_v33 }
  0xd7   : > { %1527 = vmatprep.subr.bf16.mxu1 %v1614_v29  ;;  %1551 = vmatprep.subr.bf16.mxu0 %v1614_v29 }
  0xd8   : > { %v407_v31 = vpop.permute.xlu1 %406  ;;  %v303_v32 = vpop.permute.xlu0 %302 }
  0xd9   : > { %449 = vst.msk [vmem:[#allocation2 + $0x30] sm:$0xff] %vm442_vm7, %v407_v31 }
  0xda   : > { %344 = vst.msk [vmem:[#allocation2 + $0x38] sm:$0xff] %vm336_vm6, %v303_v32  ;;  %830 = vrot.lane.b32.xlu1 %v391_v30, %s1613_s10  ;;  %762 = vrot.lane.b32.xlu0 %v287_v59, %s1611_s28 }
  0xdc   : > { %v678_v34 = vpop.permute.xlu1 %677  ;;  %v613_v35 = vpop.permute.xlu0 %612  ;;  %v878_v36 = vld [vmem:[#allocation2 + $0x18] sm:$0xff] }
  0xdd   : > { %722 = vst.msk [vmem:[#allocation2 + $0x20] sm:$0xff] %vm717_vm11, %v678_v34  ;;  %1423 = vmatmul.mubr.msk.f32.gmra.mrb[2].mxu0 %vm897_vm14, %v878_v36 }
  0xde   : > { %656 = vst.msk [vmem:[#allocation2 + $0x28] sm:$0xff] %vm650_vm10, %v613_v35  ;;  %558 = vrot.lane.b32.xlu1 %v287_v59, %s1608_s21  ;;  %316 = vrot.lane.b32.xlu0 %v285_v18, %s1607_s20  ;;  %v808_v18 = vrot.slane %v205_v8, 2 }
  0xe0   : > { %v474_v38 = vpop.permute.xlu1 %473  ;;  %v409_v23 = vpop.permute.xlu0 %408  ;;  %v809_v22 = vsel %vm353_vm1, %v806_v15, %v808_v18 }
  0xe1   : > { %516 = vst.msk [vmem:[#allocation2 + $0x30] sm:$0xff] %vm509_vm8, %v474_v38 }
  0xe2   : > { %450 = vst.msk [vmem:[#allocation2 + $0x38] sm:$0xff] %vm442_vm7, %v409_v23  ;;  %832 = vrot.lane.b32.xlu1 %v393_v62, %s1613_s10  ;;  %626 = vrot.lane.b32.xlu0 %v391_v30, %s1609_s22 }
  0xe4   : > { %v749_v39 = vpop.permute.xlu1 %748  ;;  %v680_v40 = vpop.permute.xlu0 %679 }
  0xe5   : > { %793 = vst.msk [vmem:[#allocation2 + $0x20] sm:$0xff] %vm788_vm12, %v749_v39 }
  0xe6   : > { %723 = vst.msk [vmem:[#allocation2 + $0x28] sm:$0xff] %vm717_vm11, %v680_v40  ;;  %318 = vrot.lane.b32.xlu0 %v287_v59, %s1607_s20  ;;  %422 = vrot.lane.b32.xlu1 %v391_v30, %s1606_s19 }
  0xe8   : > { %v545_v25 = vpop.permute.xlu1 %544  ;;  %v476_v42 = vpop.permute.xlu0 %475 }
  0xe9   : > { %587 = vst.msk [vmem:[#allocation2 + $0x30] sm:$0xff] %vm580_vm9, %v545_v25 }
  0xea   : > { %517 = vst.msk [vmem:[#allocation2 + $0x38] sm:$0xff] %vm509_vm8, %v476_v42  ;;  %628 = vrot.lane.b32.xlu0 %v393_v62, %s1609_s22  ;;  %693 = vrot.lane.b32.xlu1 %v200_v41, %s1610_s23 }
  0xec   : > { %v819_v47 = vpop.permute.xlu1 %818  ;;  %v751_v48 = vpop.permute.xlu0 %750 }
  0xed   : > { %863 = vst.msk [vmem:[#allocation2 + $0x20] sm:$0xff] %vm858_vm13, %v819_v47 }
  0xee   : > { %794 = vst.msk [vmem:[#allocation2 + $0x28] sm:$0xff] %vm788_vm12, %v751_v48  ;;  %424 = vrot.lane.b32.xlu0 %v393_v62, %s1606_s19  ;;  %489 = vrot.lane.b32.xlu1 %v200_v41, %s1605_s18 }
  0xf0   : > { %v547_v50 = vpop.permute.xlu1 %546  ;;  %v305_v51 = vpop.permute.xlu0 %304 }
  0xf1   : > { %588 = vst.msk [vmem:[#allocation2 + $0x38] sm:$0xff] %vm580_vm9, %v547_v50 }
  0xf2   : > { %345 = vst.msk [vmem:[#allocation2 + $0x40] sm:$0xff] %vm336_vm6, %v305_v51  ;;  %695 = vrot.lane.b32.xlu0 %v201_v43, %s1610_s23  ;;  %764 = vrot.lane.b32.xlu1 %v529_v49, %s1611_s28 }
  0xf4   : > { %v821_v56 = vpop.permute.xlu1 %820  ;;  %v615_v57 = vpop.permute.xlu0 %614  ;;  %v879_v58 = vld [vmem:[#allocation2 + $0x20] sm:$0xff] }
  0xf5   : > { %864 = vst.msk [vmem:[#allocation2 + $0x28] sm:$0xff] %vm858_vm13, %v821_v56  ;;  %1425 = vmatprep.mubr.msk.f32.mxu0 %vm897_vm14, %v879_v58 }
  0xf6   : > { %657 = vst.msk [vmem:[#allocation2 + $0x30] sm:$0xff] %vm650_vm10, %v615_v57  ;;  %491 = vrot.lane.b32.xlu0 %v201_v43, %s1605_s18  ;;  %560 = vrot.lane.b32.xlu1 %v529_v49, %s1608_s21  ;;  %s175_s18 = scalar_lea.vmem %s2159_s3, %s2161_s13 }
  0xf8   : > { %v411_v63 = vpop.permute.xlu1 %410  ;;  %v307_v0 = vpop.permute.xlu0 %306 }
  0xf9   : > { %451 = vst.msk [vmem:[#allocation2 + $0x40] sm:$0xff] %vm442_vm7, %v411_v63 }
  0xfa   : > { %346 = vst.msk [vmem:[#allocation2 + $0x48] sm:$0xff] %vm336_vm6, %v307_v0  ;;  %766 = vrot.lane.b32.xlu0 %v531_v60, %s1611_s28  ;;  %834 = vrot.lane.b32.xlu1 %v599_v61, %s1613_s10 }
  0xfc   : > { %v682_v37 = vpop.permute.xlu1 %681  ;;  %v617_v2 = vpop.permute.xlu0 %616  ;;  %v880_v3 = vld [vmem:[#allocation2 + $0x28] sm:$0xff] }
  0xfd   : > { %724 = vst.msk [vmem:[#allocation2 + $0x30] sm:$0xff] %vm717_vm11, %v682_v37  ;;  %1426 = vmatmul.mubr.msk.f32.gmra.mrb[4].mxu0 %vm897_vm14, %v880_v3 }
  0xfe   : > { %658 = vst.msk [vmem:[#allocation2 + $0x38] sm:$0xff] %vm650_vm10, %v617_v2  ;;  %562 = vrot.lane.b32.xlu0 %v531_v60, %s1608_s21  ;;  %630 = vrot.lane.b32.xlu1 %v599_v61, %s1609_s22 }
 0x100   : > { %v478_v5 = vpop.permute.xlu1 %477  ;;  %v413_v6 = vpop.permute.xlu0 %412 }
 0x101   : > { %518 = vst.msk [vmem:[#allocation2 + $0x40] sm:$0xff] %vm509_vm8, %v478_v5 }
 0x102   : > { %452 = vst.msk [vmem:[#allocation2 + $0x48] sm:$0xff] %vm442_vm7, %v413_v6  ;;  %836 = vrot.lane.b32.xlu0 %v601_v4, %s1613_s10  ;;  %632 = vrot.lane.b32.xlu1 %v601_v4, %s1609_s22 }
 0x104   : > { %v753_v12 = vpop.permute.xlu1 %752  ;;  %v684_v13 = vpop.permute.xlu0 %683 }
 0x105   : > { %795 = vst.msk [vmem:[#allocation2 + $0x30] sm:$0xff] %vm788_vm12, %v753_v12 }
 0x106   : > { %725 = vst.msk [vmem:[#allocation2 + $0x38] sm:$0xff] %vm717_vm11, %v684_v13  ;;  %697 = vrot.lane.b32.xlu0 %v203_v7, %s1610_s23  ;;  %699 = vrot.lane.b32.xlu1 %v204_v44, %s1610_s23 }
 0x108   : > { %v549_v19 = vpop.permute.xlu1 %548  ;;  %v480_v20 = vpop.permute.xlu0 %479 }
 0x109   : > { %589 = vst.msk [vmem:[#allocation2 + $0x40] sm:$0xff] %vm580_vm9, %v549_v19 }
 0x10a   : > { %519 = vst.msk [vmem:[#allocation2 + $0x48] sm:$0xff] %vm509_vm8, %v480_v20  ;;  %768 = vrot.lane.b32.xlu0 %v737_v16, %s1611_s28  ;;  %770 = vrot.lane.b32.xlu1 %v739_v17, %s1611_s28 }
 0x10c   : > { %v823_v24 = vpop.permute.xlu1 %822  ;;  %v755_v26 = vpop.permute.xlu0 %754 }
 0x10d   : > { %865 = vst.msk [vmem:[#allocation2 + $0x30] sm:$0xff] %vm858_vm13, %v823_v24 }
 0x10e   : > { %796 = vst.msk [vmem:[#allocation2 + $0x38] sm:$0xff] %vm788_vm12, %v755_v26  ;;  %838 = vrot.lane.b32.xlu0 %v807_v21, %s1613_s10  ;;  %840 = vrot.lane.b32.xlu1 %v809_v22, %s1613_s10 }
 0x110   : > { %v551_v27 = vpop.permute.xlu1 %550  ;;  %v309_v28 = vpop.permute.xlu0 %308 }
 0x111   : > { %590 = vst.msk [vmem:[#allocation2 + $0x48] sm:$0xff] %vm580_vm9, %v551_v27 }
 0x112   : > { %347 = vst.msk [vmem:[#allocation2 + $0x50] sm:$0xff] %vm336_vm6, %v309_v28 }
 0x114   : > { %v825_v30 = vpop.permute.xlu1 %824  ;;  %v619_v59 = vpop.permute.xlu0 %618  ;;  %v881_v31 = vld [vmem:[#allocation2 + $0x30] sm:$0xff] }
 0x115   : > { %866 = vst.msk [vmem:[#allocation2 + $0x38] sm:$0xff] %vm858_vm13, %v825_v30  ;;  %1428 = vmatprep.mubr.msk.f32.mxu0 %vm897_vm14, %v881_v31 }
 0x116   : > { %659 = vst.msk [vmem:[#allocation2 + $0x40] sm:$0xff] %vm650_vm10, %v619_v59 }
 0x118   : > { %v415_v32 = vpop.permute.xlu1 %414  ;;  %v311_v33 = vpop.permute.xlu0 %310 }
 0x119   : > { %453 = vst.msk [vmem:[#allocation2 + $0x50] sm:$0xff] %vm442_vm7, %v415_v32 }
 0x11a   : > { %348 = vst.msk [vmem:[#allocation2 + $0x58] sm:$0xff] %vm336_vm6, %v311_v33 }
 0x11c   : > { %v686_v34 = vpop.permute.xlu1 %685  ;;  %v621_v35 = vpop.permute.xlu0 %620  ;;  %v882_v36 = vld [vmem:[#allocation2 + $0x38] sm:$0xff] }
 0x11d   : > { %726 = vst.msk [vmem:[#allocation2 + $0x40] sm:$0xff] %vm717_vm11, %v686_v34  ;;  %1429 = vmatmul.mubr.msk.f32.gmra.mrb[6].mxu0 %vm897_vm14, %v882_v36 }
 0x11e   : > { %660 = vst.msk [vmem:[#allocation2 + $0x48] sm:$0xff] %vm650_vm10, %v621_v35 }
 0x120   : > { %v482_v62 = vpop.permute.xlu1 %481  ;;  %v417_v38 = vpop.permute.xlu0 %416 }
 0x121   : > { %520 = vst.msk [vmem:[#allocation2 + $0x50] sm:$0xff] %vm509_vm8, %v482_v62 }
 0x122   : > { %454 = vst.msk [vmem:[#allocation2 + $0x58] sm:$0xff] %vm442_vm7, %v417_v38 }
 0x124   : > { %v757_v23 = vpop.permute.xlu1 %756  ;;  %v688_v39 = vpop.permute.xlu0 %687 }
 0x125   : > { %797 = vst.msk [vmem:[#allocation2 + $0x40] sm:$0xff] %vm788_vm12, %v757_v23 }
 0x126   : > { %727 = vst.msk [vmem:[#allocation2 + $0x48] sm:$0xff] %vm717_vm11, %v688_v39 }
 0x128   : > { %v553_v40 = vpop.permute.xlu1 %552  ;;  %v484_v41 = vpop.permute.xlu0 %483 }
 0x129   : > { %591 = vst.msk [vmem:[#allocation2 + $0x50] sm:$0xff] %vm580_vm9, %v553_v40 }
 0x12a   : > { %521 = vst.msk [vmem:[#allocation2 + $0x58] sm:$0xff] %vm509_vm8, %v484_v41 }
 0x12c   : > { %v827_v25 = vpop.permute.xlu1 %826  ;;  %v759_v42 = vpop.permute.xlu0 %758 }
 0x12d   : > { %867 = vst.msk [vmem:[#allocation2 + $0x40] sm:$0xff] %vm858_vm13, %v827_v25 }
 0x12e   : > { %798 = vst.msk [vmem:[#allocation2 + $0x48] sm:$0xff] %vm788_vm12, %v759_v42 }
 0x130   : > { %v555_v43 = vpop.permute.xlu1 %554  ;;  %v313_v45 = vpop.permute.xlu0 %312 }
 0x131   : > { %592 = vst.msk [vmem:[#allocation2 + $0x58] sm:$0xff] %vm580_vm9, %v555_v43 }
 0x132   : > { %349 = vst.msk [vmem:[#allocation2 + $0x60] sm:$0xff] %vm336_vm6, %v313_v45 }
 0x134   : > { %v829_v46 = vpop.permute.xlu1 %828  ;;  %v623_v47 = vpop.permute.xlu0 %622  ;;  %v883_v48 = vld [vmem:[#allocation2 + $0x40] sm:$0xff] }
 0x135   : > { %868 = vst.msk [vmem:[#allocation2 + $0x48] sm:$0xff] %vm858_vm13, %v829_v46  ;;  %1431 = vmatprep.mubr.msk.f32.mxu0 %vm897_vm14, %v883_v48 }
 0x136   : > { %661 = vst.msk [vmem:[#allocation2 + $0x50] sm:$0xff] %vm650_vm10, %v623_v47 }
 0x138   : > { %v419_v49 = vpop.permute.xlu1 %418  ;;  %v315_v50 = vpop.permute.xlu0 %314 }
 0x139   : > { %455 = vst.msk [vmem:[#allocation2 + $0x60] sm:$0xff] %vm442_vm7, %v419_v49  ;;  %v1616_v49 = vmov 0.0  }
 0x13a   : > { %350 = vst.msk [vmem:[#allocation2 + $0x68] sm:$0xff] %vm336_vm6, %v315_v50  ;;  %1475 = vmatprep.mubr.msk.f32.mxu1 %vm1615_vm15, %v1616_v49 }
 0x13c   : > { %v690_v51 = vpop.permute.xlu1 %689  ;;  %v625_v52 = vpop.permute.xlu0 %624  ;;  %v884_v53 = vld [vmem:[#allocation2 + $0x48] sm:$0xff] }
 0x13d   : > { %728 = vst.msk [vmem:[#allocation2 + $0x50] sm:$0xff] %vm717_vm11, %v690_v51  ;;  %1432 = vmatmul.mubr.msk.f32.gmra.mrb[8].mxu0 %vm897_vm14, %v884_v53 }
 0x13e   : > { %662 = vst.msk [vmem:[#allocation2 + $0x58] sm:$0xff] %vm650_vm10, %v625_v52 }
 0x140   : > { %v486_v54 = vpop.permute.xlu1 %485  ;;  %v421_v55 = vpop.permute.xlu0 %420 }
 0x141   : > { %522 = vst.msk [vmem:[#allocation2 + $0x60] sm:$0xff] %vm509_vm8, %v486_v54 }
 0x142   : > { %456 = vst.msk [vmem:[#allocation2 + $0x68] sm:$0xff] %vm442_vm7, %v421_v55 }
 0x144   : > { %v761_v56 = vpop.permute.xlu1 %760  ;;  %v692_v57 = vpop.permute.xlu0 %691 }
 0x145   : > { %799 = vst.msk [vmem:[#allocation2 + $0x50] sm:$0xff] %vm788_vm12, %v761_v56 }
 0x146   : > { %729 = vst.msk [vmem:[#allocation2 + $0x58] sm:$0xff] %vm717_vm11, %v692_v57 }
 0x148   : > { %v557_v58 = vpop.permute.xlu1 %556  ;;  %v488_v60 = vpop.permute.xlu0 %487 }
 0x149   : > { %593 = vst.msk [vmem:[#allocation2 + $0x60] sm:$0xff] %vm580_vm9, %v557_v58 }
 0x14a   : > { %523 = vst.msk [vmem:[#allocation2 + $0x68] sm:$0xff] %vm509_vm8, %v488_v60 }
 0x14c   : > { %v831_v61 = vpop.permute.xlu1 %830  ;;  %v763_v63 = vpop.permute.xlu0 %762 }
 0x14d   : > { %869 = vst.msk [vmem:[#allocation2 + $0x50] sm:$0xff] %vm858_vm13, %v831_v61 }
 0x14e   : > { %800 = vst.msk [vmem:[#allocation2 + $0x58] sm:$0xff] %vm788_vm12, %v763_v63 }
 0x150   : > { %v559_v0 = vpop.permute.xlu1 %558  ;;  %v317_v1 = vpop.permute.xlu0 %316 }
 0x151   : > { %594 = vst.msk [vmem:[#allocation2 + $0x68] sm:$0xff] %vm580_vm9, %v559_v0 }
 0x152   : > { %351 = vst.msk [vmem:[#allocation2 + $0x70] sm:$0xff] %vm336_vm6, %v317_v1 }
 0x154   : > { %v833_v37 = vpop.permute.xlu1 %832  ;;  %v627_v2 = vpop.permute.xlu0 %626  ;;  %v885_v3 = vld [vmem:[#allocation2 + $0x50] sm:$0xff] }
 0x155   : > { %870 = vst.msk [vmem:[#allocation2 + $0x58] sm:$0xff] %vm858_vm13, %v833_v37  ;;  %1434 = vmatprep.mubr.msk.f32.mxu0 %vm897_vm14, %v885_v3 }
 0x156   : > { %663 = vst.msk [vmem:[#allocation2 + $0x60] sm:$0xff] %vm650_vm10, %v627_v2 }
 0x158   : > { %v319_v4 = vpop.permute.xlu0 %318  ;;  %v423_v5 = vpop.permute.xlu1 %422 }
 0x159   : > { %352 = vst.msk [vmem:[#allocation2 + $0x78] sm:$0xff] %vm336_vm6, %v319_v4 }
 0x15a   : > { %457 = vst.msk [vmem:[#allocation2 + $0x70] sm:$0xff] %vm442_vm7, %v423_v5 }
 0x15c   : > { %v629_v6 = vpop.permute.xlu0 %628  ;;  %v694_v7 = vpop.permute.xlu1 %693  ;;  %v886_v44 = vld [vmem:[#allocation2 + $0x58] sm:$0xff] }
 0x15d   : > { %664 = vst.msk [vmem:[#allocation2 + $0x68] sm:$0xff] %vm650_vm10, %v629_v6  ;;  %1435 = vmatmul.mubr.msk.f32.gmra.mrb[10].mxu0 %vm897_vm14, %v886_v44 }
 0x15e   : > { %730 = vst.msk [vmem:[#allocation2 + $0x60] sm:$0xff] %vm717_vm11, %v694_v7 }
 0x160   : > { %v425_v8 = vpop.permute.xlu0 %424  ;;  %v490_v9 = vpop.permute.xlu1 %489 }
 0x161   : > { %458 = vst.msk [vmem:[#allocation2 + $0x78] sm:$0xff] %vm442_vm7, %v425_v8 }
 0x162   : > { %524 = vst.msk [vmem:[#allocation2 + $0x70] sm:$0xff] %vm509_vm8, %v490_v9 }
 0x164   : > { %v696_v10 = vpop.permute.xlu0 %695  ;;  %v765_v11 = vpop.permute.xlu1 %764 }
 0x165   : > { %731 = vst.msk [vmem:[#allocation2 + $0x68] sm:$0xff] %vm717_vm11, %v696_v10 }
 0x166   : > { %801 = vst.msk [vmem:[#allocation2 + $0x60] sm:$0xff] %vm788_vm12, %v765_v11 }
 0x168   : > { %v492_v12 = vpop.permute.xlu0 %491  ;;  %v561_v13 = vpop.permute.xlu1 %560 }
 0x169   : > { %525 = vst.msk [vmem:[#allocation2 + $0x78] sm:$0xff] %vm509_vm8, %v492_v12 }
 0x16a   : > { %595 = vst.msk [vmem:[#allocation2 + $0x70] sm:$0xff] %vm580_vm9, %v561_v13 }
 0x16c   : > { %v767_v14 = vpop.permute.xlu0 %766  ;;  %v835_v15 = vpop.permute.xlu1 %834 }
 0x16d   : > { %802 = vst.msk [vmem:[#allocation2 + $0x68] sm:$0xff] %vm788_vm12, %v767_v14 }
 0x16e   : > { %871 = vst.msk [vmem:[#allocation2 + $0x60] sm:$0xff] %vm858_vm13, %v835_v15 }
 0x170   : > { %v563_v16 = vpop.permute.xlu0 %562  ;;  %v631_v17 = vpop.permute.xlu1 %630 }
 0x171   : > { %596 = vst.msk [vmem:[#allocation2 + $0x78] sm:$0xff] %vm580_vm9, %v563_v16  ;;  %v1617_v16 = vmov 1.0  }
 0x172   : > { %665 = vst.msk [vmem:[#allocation2 + $0x70] sm:$0xff] %vm650_vm10, %v631_v17 }
 0x174   : > { %v837_v18 = vpop.permute.xlu0 %836  ;;  %v633_v19 = vpop.permute.xlu1 %632 }
 0x175   : > { %v887_v20 = vld [vmem:[#allocation2 + $0x60] sm:$0xff]  ;;  %872 = vst.msk [vmem:[#allocation2 + $0x68] sm:$0xff] %vm858_vm13, %v837_v18 }
 0x176   : > { %666 = vst.msk [vmem:[#allocation2 + $0x78] sm:$0xff] %vm650_vm10, %v633_v19  ;;  %1437 = vmatprep.mubr.msk.f32.mxu0 %vm897_vm14, %v887_v20 }
 0x178   : > { %v698_v21 = vpop.permute.xlu0 %697  ;;  %v700_v22 = vpop.permute.xlu1 %699 }
 0x179   : > { %732 = vst.msk [vmem:[#allocation2 + $0x70] sm:$0xff] %vm717_vm11, %v698_v21  ;;  %733 = vst.msk [vmem:[#allocation2 + $0x78] sm:$0xff] %vm717_vm11, %v700_v22 }
 0x17c   : > { %v769_v24 = vpop.permute.xlu0 %768  ;;  %v771_v26 = vpop.permute.xlu1 %770  ;;  %v888_v27 = vld [vmem:[#allocation2 + $0x68] sm:$0xff] }
 0x17d   : > { %803 = vst.msk [vmem:[#allocation2 + $0x70] sm:$0xff] %vm788_vm12, %v769_v24  ;;  %804 = vst.msk [vmem:[#allocation2 + $0x78] sm:$0xff] %vm788_vm12, %v771_v26  ;;  %1438 = vmatmul.mubr.msk.f32.gmra.mrb[12].mxu0 %vm897_vm14, %v888_v27 }
 0x180   : > { %v839_v28 = vpop.permute.xlu0 %838  ;;  %v841_v30 = vpop.permute.xlu1 %840 }
 0x181   : > { %873 = vst.msk [vmem:[#allocation2 + $0x70] sm:$0xff] %vm858_vm13, %v839_v28  ;;  %874 = vst.msk [vmem:[#allocation2 + $0x78] sm:$0xff] %vm858_vm13, %v841_v30 }
 0x188   : > { %v889_v59 = vld [vmem:[#allocation2 + $0x70] sm:$0xff]  ;;  %v890_v31 = vld [vmem:[#allocation2 + $0x78] sm:$0xff] }
 0x189   : > { %1440 = vmatprep.mubr.msk.f32.mxu0 %vm897_vm14, %v889_v59 }
 0x18a   : > { %1441 = vmatmul.mubr.msk.f32.gmra.mrb[14].mxu0 %vm897_vm14, %v890_v31 }
 0x18b   : > { %1510 = vmatprep.mubr.msk.f32.mxu0 %vm1615_vm15, %v1616_v49 }
 0x190   : > { %v1421_v32 = vpop.f32.mrb[0].mxu0 }
 0x191   : > { %v1168_v33 = vmul.f32 %v1421_v32, %v1421_v32  ;;  %v1016_v34 = vpop.f32.mrb[1].mxu0 }
 0x192   : > { %v1167_v35 = vmul.f32 %v1016_v34, %v1016_v34  ;;  %v1528_v36 = vpack.c.bf16 %v1421_v32, %v1016_v34 }
 0x194   : > { %v1552_v62 = vpack.c.bf16 %v1168_v33, %v1167_v35  ;;  %1529 = vmatpush3.bf16.msra.mxu1 %v1528_v36 }
 0x195   : > { %1530 = vmatprep.subr.bf16.mxu1 %v1614_v29 }
 0x196   : > { %1553 = vmatpush3.bf16.msra.mxu0 %v1552_v62 }
 0x197   : > { %1554 = vmatprep.subr.bf16.mxu0 %v1614_v29 }
 0x1b0   : > { %v1424_v38 = vpop.f32.mrb[2].mxu0 }
 0x1b1   : > { %v1170_v23 = vmul.f32 %v1424_v38, %v1424_v38  ;;  %v1026_v39 = vpop.f32.mrb[3].mxu0 }
 0x1b2   : > { %v1531_v40 = vpack.c.bf16 %v1424_v38, %v1026_v39  ;;  %v1169_v41 = vmul.f32 %v1026_v39, %v1026_v39 }
 0x1b4   : > { %v1555_v25 = vpack.c.bf16 %v1170_v23, %v1169_v41  ;;  %1532 = vmatpush3.bf16.msra.mxu1 %v1531_v40 }
 0x1b5   : > { %1533 = vmatprep.subr.bf16.mxu1 %v1614_v29 }
 0x1b6   : > { %1556 = vmatpush3.bf16.msra.mxu0 %v1555_v25 }
 0x1b7   : > { %1557 = vmatprep.subr.bf16.mxu0 %v1614_v29 }
 0x1d0   : > { %v1427_v42 = vpop.f32.mrb[4].mxu0 }
 0x1d1   : > { %v1172_v43 = vmul.f32 %v1427_v42, %v1427_v42  ;;  %v1036_v45 = vpop.f32.mrb[5].mxu0 }
 0x1d2   : > { %v1534_v46 = vpack.c.bf16 %v1427_v42, %v1036_v45  ;;  %v1171_v47 = vmul.f32 %v1036_v45, %v1036_v45 }
 0x1d4   : > { %v1558_v48 = vpack.c.bf16 %v1172_v43, %v1171_v47  ;;  %1535 = vmatpush3.bf16.msra.mxu1 %v1534_v46 }
 0x1d5   : > { %1536 = vmatprep.subr.bf16.mxu1 %v1614_v29 }
 0x1d6   : > { %1559 = vmatpush3.bf16.msra.mxu0 %v1558_v48 }
 0x1d7   : > { %1560 = vmatprep.subr.bf16.mxu0 %v1614_v29 }
 0x1f0   : > { %v1430_v50 = vpop.f32.mrb[6].mxu0 }
 0x1f1   : > { %v1174_v51 = vmul.f32 %v1430_v50, %v1430_v50  ;;  %v1046_v52 = vpop.f32.mrb[7].mxu0 }
 0x1f2   : > { %v1537_v53 = vpack.c.bf16 %v1430_v50, %v1046_v52  ;;  %v1173_v54 = vmul.f32 %v1046_v52, %v1046_v52 }
 0x1f4   : > { %v1561_v55 = vpack.c.bf16 %v1174_v51, %v1173_v54  ;;  %1538 = vmatpush3.bf16.msra.mxu1 %v1537_v53 }
 0x1f5   : > { %1539 = vmatprep.subr.bf16.mxu1 %v1614_v29 }
 0x1f6   : > { %1562 = vmatpush3.bf16.msra.mxu0 %v1561_v55 }
 0x1f7   : > { %1563 = vmatprep.subr.bf16.mxu0 %v1614_v29 }
 0x210   : > { %v1433_v56 = vpop.f32.mrb[8].mxu0 }
 0x211   : > { %v1176_v57 = vmul.f32 %v1433_v56, %v1433_v56  ;;  %v1056_v58 = vpop.f32.mrb[9].mxu0 }
 0x212   : > { %v1540_v60 = vpack.c.bf16 %v1433_v56, %v1056_v58  ;;  %v1175_v61 = vmul.f32 %v1056_v58, %v1056_v58 }
 0x214   : > { %v1564_v63 = vpack.c.bf16 %v1176_v57, %v1175_v61  ;;  %1541 = vmatpush3.bf16.msra.mxu1 %v1540_v60 }
 0x215   : > { %1542 = vmatprep.subr.bf16.mxu1 %v1614_v29 }
 0x216   : > { %1565 = vmatpush3.bf16.msra.mxu0 %v1564_v63 }
 0x217   : > { %1566 = vmatprep.subr.bf16.mxu0 %v1614_v29 }
 0x230   : > { %v1436_v0 = vpop.f32.mrb[10].mxu0 }
 0x231   : > { %v1178_v1 = vmul.f32 %v1436_v0, %v1436_v0  ;;  %v1066_v37 = vpop.f32.mrb[11].mxu0 }
 0x232   : > { %v1543_v2 = vpack.c.bf16 %v1436_v0, %v1066_v37  ;;  %v1177_v3 = vmul.f32 %v1066_v37, %v1066_v37 }
 0x234   : > { %v1567_v4 = vpack.c.bf16 %v1178_v1, %v1177_v3  ;;  %1544 = vmatpush3.bf16.msra.mxu1 %v1543_v2 }
 0x235   : > { %1545 = vmatprep.subr.bf16.mxu1 %v1614_v29 }
 0x236   : > { %1568 = vmatpush3.bf16.msra.mxu0 %v1567_v4 }
 0x237   : > { %1569 = vmatprep.subr.bf16.mxu0 %v1614_v29 }
 0x250   : > { %v1439_v5 = vpop.f32.mrb[12].mxu0 }
 0x251   : > { %v1180_v6 = vmul.f32 %v1439_v5, %v1439_v5  ;;  %v1076_v7 = vpop.f32.mrb[13].mxu0 }
 0x252   : > { %v1546_v44 = vpack.c.bf16 %v1439_v5, %v1076_v7  ;;  %v1179_v8 = vmul.f32 %v1076_v7, %v1076_v7 }
 0x254   : > { %v1570_v9 = vpack.c.bf16 %v1180_v6, %v1179_v8  ;;  %1547 = vmatpush3.bf16.msra.mxu1 %v1546_v44 }
 0x255   : > { %1548 = vmatprep.subr.bf16.mxu1 %v1614_v29 }
 0x256   : > { %1571 = vmatpush3.bf16.msra.mxu0 %v1570_v9 }
 0x257   : > { %1572 = vmatprep.subr.bf16.mxu0 %v1614_v29 }
 0x25d   : > { %v1442_v10 = vpop.f32.mrb[14].mxu0 }
 0x25e   : > { %v1182_v11 = vmul.f32 %v1442_v10, %v1442_v10  ;;  %v1086_v12 = vpop.f32.mrb[15].mxu0 }
 0x25f   : > { %v1549_v13 = vpack.c.bf16 %v1442_v10, %v1086_v12  ;;  %v1181_v14 = vmul.f32 %v1086_v12, %v1086_v12 }
 0x261   : > { %v1573_v15 = vpack.c.bf16 %v1182_v11, %v1181_v14  ;;  %1550 = vmatpush3.bf16.msra.mxu1 %v1549_v13 }
 0x263   : > { %1574 = vmatpush3.bf16.msra.mxu0 %v1573_v15 }
 0x264   : > { %1476 = vmatmul.mubr.f32.vlgmr.msra.gmra.mrb[0].mxu1 %v1617_v16 }
 0x266   : > { %1511 = vmatmul.mubr.f32.vlgmr.msra.gmra.mrb[16].mxu0 %v1617_v16 }
 0x337   : > { %v1161_v17 = vpop.f32.mrb[0].mxu1 }
 0x338   : > { %1166 = vst.msk [vmem:[%s172_s15] sm:$0x1] %vm1165_vm0, %v1161_v17  ;;  %v1477_v29 = vpop.f32.mrb[1].mxu1 }
 0x339   : > { %v1249_v18 = vpop.f32.mrb[16].mxu0 }
 0x33a   : > { %1253 = vst.msk [vmem:[%s175_s18] sm:$0x1] %vm1165_vm0, %v1249_v18  ;;  %v1512_v19 = vpop.f32.mrb[17].mxu0 }
 0x33b PF: > { %s14_s12 = sadd.s32 1, %s1603_s12  }
 0x33c   : > { %p11_p4 = scmp.ge.s32.totalorder %s14_s12, 6  }
 0x33e   :  { %13 = sbr.rel (!%p11_p4) target bundleno = 1 (0x1), region = 70 }

// kernel: blue_block.3
= control target key start
LH: loop header
LB: loop body
LE: loop exit
PB: predicated region body
PF: predicated region fallthrough
CT: control target
= control target key end

     0   :  { %s1419_s15 = smov 0   ;;  %s2051_s0 = inlined_call_operand.vmem [shape: f32[4,10,18,5], index: 0, kind: input, shape index: {}]   ;;  %s2052_s1 = inlined_call_operand.vmem [shape: f32[45,32], index: 1, kind: input, shape index: {}]   ;;  %s2053_s2 = inlined_call_operand.vmem [shape: f32[1,32], index: 2, kind: input, shape index: {}]   ;;  %s2054_s3 = inlined_call_operand.vmem [shape: f32[1,32], index: 3, kind: input, shape index: {}]   ;;  %s2055_s4 = inlined_call_operand.vmem [shape: f32[4,128,32], index: 4, kind: output, shape index: {}]  }
   0x1 LB: > { %s1251_s16 = sadd.s32 4294967295, %s1383_s15   ;;  %p1255_p0 = scmp.ge.s32.totalorder %s1383_s15, 1  ;;  %s1383_s15 = sphi %s1419_s15, %s14_s15  }
   0x2   : > { %p162_p1 = scmp.lt.s32.totalorder %s1383_s15, 5 }
   0x4   : > { %p163_p2 = pnand %p1255_p0, %p162_p1 }
   0x5   : > { %p188_p3 = scmp.lt.s32.totalorder (!%p163_p2), %s1251_s16, 3  ;;  %vm228_vm0 = vcmask (!%p163_p2), 39936   ;;  %vm269_vm1 = vcmask (!%p163_p2), 1046528   ;;  %s1385_s21 = smov (!%p163_p2), 5   ;;  %vm375_vm2 = vcmask (!%p163_p2), 1045504   ;;  %vm968_vm3 = vcmask (!%p163_p2), 1044480  }
   0x6   : > { %166 = sbr.rel (%p163_p2) target bundleno = 617 (0x269), region = 36  ;;  %s1386_s22 = smov (!%p163_p2), 10   ;;  %vm1393_vm4 = vmmov (!%p163_p2), 1   ;;  %vm358_vm6 = vcmask (!%p163_p2), 80936   ;;  %vm464_vm7 = vcmask (!%p163_p2), 121936   ;;  %vm531_vm8 = vcmask (!%p163_p2), 162936  }
   0x7   : > { %s1387_s23 = smov (!%p163_p2), 15   ;;  %s1388_s24 = smov (!%p163_p2), 20   ;;  %vm1348_vm5 = vmpackc.low (!%p163_p2), %vm968_vm3, %vm1393_vm4  ;;  %vm602_vm9 = vcmask (!%p163_p2), 203936   ;;  %vm672_vm10 = vcmask (!%p163_p2), 244936   ;;  %vm739_vm11 = vcmask (!%p163_p2), 285936   ;;  %vm810_vm12 = vcmask (!%p163_p2), 326936  }
   0x8   : > { %s1389_s25 = smov (!%p163_p2), 25   ;;  %s1390_s26 = smov (!%p163_p2), 30   ;;  %vm880_vm13 = vcmask (!%p163_p2), 367936   ;;  %vm919_vm14 = vcmask (!%p163_p2), 367616   ;;  %vm1179_vm15 = vcmask (!%p163_p2), 261120  }
   0x9   : > { %s1391_s27 = smov (!%p163_p2), 35   ;;  %s1392_s6 = smov (!%p163_p2), 40  }
   0xd   : > { %s2057_s16 = smov (!%p188_p3, %s1251_s16), 3 }
   0xe   : > { %s1359_s17 = smul.u32 240, %s2057_s16 }
  0x10   : > { %s1433_s20 = scalar_lea.vmem %s2051_s0, %s1359_s17 }
  0x11   : > { %v1436_v0 = vld [vmem:[%s1433_s20 + $0x8] sm:$0xff]  ;;  %v1439_v1 = vld [vmem:[%s1433_s20 + $0x10] sm:$0x3]  ;;  %v198_v2 = vld [vmem:[%s1433_s20] sm:$0xff] }
  0x12   : > { %v271_v3 = vrot.slane %v1436_v0, 1  ;;  %v273_v4 = vrot.slane %v1439_v1, 1  ;;  %v270_v5 = vrot.slane %v198_v2, 1  ;;  %v1445_v6 = vld [vmem:[%s1433_s20 + $0x68] sm:$0xff]  ;;  %v212_v7 = vld [vmem:[%s1433_s20 + $0x70] sm:$0x3] }
  0x13   : > { %230 = vst.msk [vmem:[#allocation2 + $0x8] sm:$0xff] %vm228_vm0, %v1436_v0  ;;  %229 = vst.msk [vmem:[#allocation2] sm:$0xff] %vm228_vm0, %v198_v2  ;;  %v291_v8 = vrot.slane %v1445_v6, 1  ;;  %v293_v9 = vrot.slane %v212_v7, 1  ;;  %v1453_v10 = vld [vmem:[%s1433_s20 + $0x60] sm:$0xff]  ;;  %v1456_v11 = vld [vmem:[%s1433_s20 + $0x78] sm:$0xff] }
  0x14   : > { %238 = vst.msk [vmem:[#allocation2 + $0x48] sm:$0xff] %vm228_vm0, %v1445_v6  ;;  %v274_v12 = vsel %vm269_vm1, %v271_v3, %v273_v4  ;;  %v272_v13 = vsel %vm269_vm1, %v270_v5, %v271_v3  ;;  %v290_v14 = vrot.slane %v1453_v10, 1  ;;  %v1464_v15 = vld [vmem:[%s1433_s20 + $0x18] sm:$0xff]  ;;  %v1467_v16 = vld [vmem:[%s1433_s20 + $0x80] sm:$0xff]  ;;  %237 = vst.msk [vmem:[#allocation2 + $0x40] sm:$0xff] %vm228_vm0, %v1453_v10  ;;  %v397_v18 = vrot.slane %v1445_v6, 2 }
  0x15   : > { %v1470_v17 = vld [vmem:[%s1433_s20 + $0x20] sm:$0xff]  ;;  %239 = vst.msk [vmem:[#allocation2 + $0x50] sm:$0xff] %vm228_vm0, %v1456_v11  ;;  %312 = vrot.lane.b32.xlu1 %v274_v12, %s1385_s21  ;;  %310 = vrot.lane.b32.xlu0 %v272_v13, %s1385_s21  ;;  %v376_v19 = vrot.slane %v198_v2, 2  ;;  %v1480_v20 = vld [vmem:[%s1433_s20 + $0x90] sm:$0xff]  ;;  %231 = vst.msk [vmem:[#allocation2 + $0x10] sm:$0xff] %vm228_vm0, %v1464_v15  ;;  %v1489_v21 = vsel %vm269_vm1, %v291_v8, %v293_v9  ;;  %v396_v23 = vrot.slane %v1453_v10, 2 }
  0x16   : > { %232 = vst.msk [vmem:[#allocation2 + $0x18] sm:$0xff] %vm228_vm0, %v1470_v17  ;;  %240 = vst.msk [vmem:[#allocation2 + $0x58] sm:$0xff] %vm228_vm0, %v1467_v16  ;;  %v1492_v22 = vsel %vm269_vm1, %v290_v14, %v291_v8  ;;  %v377_v24 = vrot.slane %v1436_v0, 2  ;;  %v1497_v25 = vld [vmem:[%s1433_s20 + $0x30] sm:$0xff]  ;;  %v1500_v26 = vld [vmem:[%s1433_s20 + $0x98] sm:$0xff]  ;;  %v399_v34 = vrot.slane %v212_v7, 2 }
  0x17   : > { %241 = vst.msk [vmem:[#allocation2 + $0x60] sm:$0xff] %vm228_vm0, %v1480_v20  ;;  %v1505_v27 = vld [vmem:[%s1433_s20 + $0x38] sm:$0xff]  ;;  %233 = vst.msk [vmem:[#allocation2 + $0x20] sm:$0xff] %vm228_vm0, %v1497_v25  ;;  %v1514_v28 = vld [vmem:[%s1433_s20 + $0xa8] sm:$0xff]  ;;  %v1536_v32 = vsel %vm375_vm2, %v396_v23, %v397_v18  ;;  %v379_v35 = vrot.slane %v1439_v1, 2  ;;  %v295_v38 = vrot.slane %v1456_v11, 1 }
  0x18   : > { %242 = vst.msk [vmem:[#allocation2 + $0x68] sm:$0xff] %vm228_vm0, %v1500_v26  ;;  %234 = vst.msk [vmem:[#allocation2 + $0x28] sm:$0xff] %vm228_vm0, %v1505_v27  ;;  %v1517_v29 = vld [vmem:[%s1433_s20 + $0x48] sm:$0xff]  ;;  %v1520_v30 = vld [vmem:[%s1433_s20 + $0xb0] sm:$0xff]  ;;  %v378_v33 = vsel %vm375_vm2, %v376_v19, %v377_v24  ;;  %v1546_v36 = vsel %vm375_vm2, %v397_v18, %v399_v34  ;;  %v296_v39 = vrot.slane %v1467_v16, 1  ;;  %v275_v40 = vrot.slane %v1464_v15, 1 }
  0x19   : > { %328 = vrot.lane.b32.xlu1 %v1489_v21, %s1385_s21  ;;  %326 = vrot.lane.b32.xlu0 %v1492_v22, %s1385_s21  ;;  %243 = vst.msk [vmem:[#allocation2 + $0x70] sm:$0xff] %vm228_vm0, %v1514_v28  ;;  %235 = vst.msk [vmem:[#allocation2 + $0x30] sm:$0xff] %vm228_vm0, %v1517_v29  ;;  %v1533_v31 = vld [vmem:[%s1433_s20 + $0x50] sm:$0xff]  ;;  %v380_v37 = vsel %vm375_vm2, %v377_v24, %v379_v35  ;;  %v276_v41 = vrot.slane %v1470_v17, 1  ;;  %v215_v44 = vld [vmem:[%s1433_s20 + $0x88] sm:$0x3] }
  0x1a   : > { %244 = vst.msk [vmem:[#allocation2 + $0x78] sm:$0xff] %vm228_vm0, %v1520_v30  ;;  %236 = vst.msk [vmem:[#allocation2 + $0x38] sm:$0xff] %vm228_vm0, %v1533_v31  ;;  %v1565_v42 = vsel %vm269_vm1, %v295_v38, %v296_v39  ;;  %v203_v45 = vld [vmem:[%s1433_s20 + $0x28] sm:$0x3]  ;;  %v298_v46 = vrot.slane %v215_v44, 1  ;;  %v401_v48 = vrot.slane %v1456_v11, 2 }
  0x1b   : > { %v277_v43 = vsel %vm269_vm1, %v275_v40, %v276_v41  ;;  %v278_v47 = vrot.slane %v203_v45, 1  ;;  %v402_v49 = vrot.slane %v1467_v16, 2  ;;  %v381_v52 = vrot.slane %v1464_v15, 2  ;;  %v218_v2 = vld [vmem:[%s1433_s20 + $0xa0] sm:$0x3]  ;;  %v915_v23 = vld [vmem:[%s2052_s1 + $0x10] sm:$0xff] }
  0x1c   : > { %v1579_v50 = vsel %vm269_vm1, %v296_v39, %v298_v46  ;;  %v382_v53 = vrot.slane %v1470_v17, 2  ;;  %v404_v56 = vrot.slane %v215_v44, 2  ;;  %v384_v57 = vrot.slane %v203_v45, 2  ;;  %v206_v3 = vld [vmem:[%s1433_s20 + $0x40] sm:$0x3]  ;;  %v916_v24 = vld [vmem:[%s2052_s1 + $0x18] sm:$0xff] }
  0x1d   : > { %432 = vrot.lane.b32.xlu1 %v1536_v32, %s1386_s22  ;;  %416 = vrot.lane.b32.xlu0 %v378_v33, %s1386_s22  ;;  %v279_v51 = vsel %vm269_vm1, %v276_v41, %v278_v47  ;;  %v1588_v54 = vsel %vm375_vm2, %v401_v48, %v402_v49  ;;  %v300_v60 = vrot.slane %v1480_v20, 1  ;;  %v301_v61 = vrot.slane %v1500_v26, 1 }
  0x1e   : > { %v383_v55 = vsel %vm375_vm2, %v381_v52, %v382_v53  ;;  %v1601_v58 = vsel %vm375_vm2, %v402_v49, %v404_v56  ;;  %v385_v59 = vsel %vm375_vm2, %v382_v53, %v384_v57  ;;  %v280_v62 = vrot.slane %v1497_v25, 1 }
  0x1f   : > { %v281_v63 = vrot.slane %v1505_v27, 1  ;;  %v302_v0 = vsel %vm269_vm1, %v300_v60, %v301_v61  ;;  %v303_v4 = vrot.slane %v218_v2, 1  ;;  %v283_v5 = vrot.slane %v206_v3, 1  ;;  %v209_v60 = vld [vmem:[%s1433_s20 + $0x58] sm:$0x3] }
  0x20   : > { %v406_v7 = vrot.slane %v1480_v20, 2  ;;  %v407_v8 = vrot.slane %v1500_v26, 2  ;;  %v386_v13 = vrot.slane %v1497_v25, 2  ;;  %v387_v14 = vrot.slane %v1505_v27, 2 }
  0x21   : > { %434 = vrot.lane.b32.xlu1 %v1546_v36, %s1386_s22  ;;  %418 = vrot.lane.b32.xlu0 %v380_v37, %s1386_s22  ;;  %v282_v1 = vsel %vm269_vm1, %v280_v62, %v281_v63  ;;  %v304_v9 = vsel %vm269_vm1, %v301_v61, %v303_v4  ;;  %v284_v12 = vsel %vm269_vm1, %v281_v63, %v283_v5  ;;  %v409_v34 = vrot.slane %v218_v2, 2 }
  0x22   : > { %v408_v18 = vsel %vm375_vm2, %v406_v7, %v407_v8  ;;  %v388_v19 = vsel %vm375_vm2, %v386_v13, %v387_v14  ;;  %v389_v35 = vrot.slane %v206_v3, 2  ;;  %v305_v46 = vrot.slane %v1514_v28, 1 }
  0x23   : > { %v410_v37 = vsel %vm375_vm2, %v407_v8, %v409_v34  ;;  %v306_v47 = vrot.slane %v1520_v30, 1  ;;  %v285_v48 = vrot.slane %v1517_v29, 1  ;;  %v286_v49 = vrot.slane %v1533_v31, 1 }
  0x24   : > { %v390_v38 = vsel %vm375_vm2, %v387_v14, %v389_v35  ;;  %v411_v5 = vrot.slane %v1514_v28, 2  ;;  %v412_v7 = vrot.slane %v1520_v30, 2  ;;  %v391_v8 = vrot.slane %v1517_v29, 2 }
  0x25   : > { %499 = vrot.lane.b32.xlu1 %v1456_v11, %s1387_s23  ;;  %483 = vrot.lane.b32.xlu0 %v1464_v15, %s1387_s23  ;;  %v913_v15 = vld [vmem:[%s2052_s1] sm:$0xff]  ;;  %v307_v53 = vsel %vm269_vm1, %v305_v46, %v306_v47 }
  0x26   : > { %v413_v14 = vsel %vm375_vm2, %v411_v5, %v412_v7 }
  0x29   : > { %501 = vrot.lane.b32.xlu1 %v1467_v16, %s1387_s23  ;;  %485 = vrot.lane.b32.xlu0 %v1470_v17, %s1387_s23  ;;  %v914_v17 = vld [vmem:[%s2052_s1 + $0x8] sm:$0xff] }
  0x2d   : > { %570 = vrot.lane.b32.xlu1 %v1565_v42, %s1388_s24  ;;  %554 = vrot.lane.b32.xlu0 %v277_v43, %s1388_s24 }
  0x31   : > { %330 = vrot.lane.b32.xlu1 %v1565_v42, %s1385_s21  ;;  %314 = vrot.lane.b32.xlu0 %v277_v43, %s1385_s21 }
  0x35   : > { %572 = vrot.lane.b32.xlu1 %v1579_v50, %s1388_s24  ;;  %556 = vrot.lane.b32.xlu0 %v279_v51, %s1388_s24 }
  0x39   : > { %640 = vrot.lane.b32.xlu1 %v1588_v54, %s1389_s25  ;;  %624 = vrot.lane.b32.xlu0 %v383_v55, %s1389_s25 }
  0x3d   : > { %332 = vrot.lane.b32.xlu1 %v1579_v50, %s1385_s21  ;;  %316 = vrot.lane.b32.xlu0 %v279_v51, %s1385_s21 }
  0x41   : > { %436 = vrot.lane.b32.xlu1 %v1588_v54, %s1386_s22  ;;  %420 = vrot.lane.b32.xlu0 %v383_v55, %s1386_s22  ;;  %v287_v55 = vsel %vm269_vm1, %v285_v48, %v286_v49 }
  0x45   : > { %642 = vrot.lane.b32.xlu1 %v1601_v58, %s1389_s25  ;;  %626 = vrot.lane.b32.xlu0 %v385_v59, %s1389_s25 }
  0x49   : > { %707 = vrot.lane.b32.xlu1 %v1480_v20, %s1390_s26  ;;  %691 = vrot.lane.b32.xlu0 %v1497_v25, %s1390_s26 }
  0x4d   : > { %438 = vrot.lane.b32.xlu1 %v1601_v58, %s1386_s22  ;;  %422 = vrot.lane.b32.xlu0 %v385_v59, %s1386_s22  ;;  %v221_v59 = vld [vmem:[%s1433_s20 + $0xb8] sm:$0x3] }
  0x4e   : > { %v308_v63 = vrot.slane %v221_v59, 1 }
  0x50   : > { %v309_v3 = vsel %vm269_vm1, %v306_v47, %v308_v63 }
  0x51   : > { %503 = vrot.lane.b32.xlu1 %v1480_v20, %s1387_s23  ;;  %487 = vrot.lane.b32.xlu0 %v1497_v25, %s1387_s23  ;;  %v1339_v20 = vpack.c.bf16 %v914_v17, %v913_v15  ;;  %v1343_v25 = vpack.c.bf16 %v916_v24, %v915_v23 }
  0x53   : > { %1340 = vmatprep.subr.bf16.mxu0 %v1339_v20  ;;  %1353 = vmatprep.subr.bf16.mxu1 %v1339_v20 }
  0x54   : > { %1342 = vmatpush3.bf16.msra.mxu0 %v1339_v20  ;;  %1356 = vmatpush3.bf16.msra.mxu1 %v1339_v20  ;;  %v394_v20 = vrot.slane %v209_v60, 2 }
  0x55   : > { %709 = vrot.lane.b32.xlu1 %v1500_v26, %s1390_s26  ;;  %693 = vrot.lane.b32.xlu0 %v1505_v27, %s1390_s26 }
  0x56   : > { %1344 = vmatprep.subr.bf16.mxu0 %v1343_v25  ;;  %1354 = vmatprep.subr.bf16.mxu1 %v1343_v25 }
  0x58   : > { %1346 = vmatpush3.bf16.msra.mxu0 %v1343_v25  ;;  %1357 = vmatpush3.bf16.msra.mxu1 %v1343_v25 }
  0x59   : > { %778 = vrot.lane.b32.xlu1 %v302_v0, %s1391_s27  ;;  %762 = vrot.lane.b32.xlu0 %v282_v1, %s1391_s27 }
  0x5d   : > { %505 = vrot.lane.b32.xlu1 %v1500_v26, %s1387_s23  ;;  %489 = vrot.lane.b32.xlu0 %v1505_v27, %s1387_s23  ;;  %v917_v26 = vld [vmem:[%s2052_s1 + $0x20] sm:$0xff]  ;;  %v918_v27 = vld [vmem:[%s2052_s1 + $0x28] sm:$0x1f] }
  0x5e   : > { %v1347_v33 = vpack.c.bf16 %v918_v27, %v917_v26 }
  0x60   : > { %1349 = vmatprep.subr.msk.bf16.mxu0 %vm1348_vm5, %v1347_v33  ;;  %1355 = vmatprep.subr.msk.bf16.mxu1 %vm1348_vm5, %v1347_v33 }
  0x61   : > { %574 = vrot.lane.b32.xlu1 %v302_v0, %s1388_s24  ;;  %558 = vrot.lane.b32.xlu0 %v282_v1, %s1388_s24 }
  0x62   : > { %1352 = vmatpush3.bf16.msk.msra.mxu0 %vm1348_vm5, %v1347_v33  ;;  %1358 = vmatpush3.bf16.msk.msra.mxu1 %vm1348_vm5, %v1347_v33 }
  0x65   : > { %780 = vrot.lane.b32.xlu1 %v304_v9, %s1391_s27  ;;  %764 = vrot.lane.b32.xlu0 %v284_v12, %s1391_s27 }
  0x69   : > { %848 = vrot.lane.b32.xlu1 %v408_v18, %s1392_s6  ;;  %832 = vrot.lane.b32.xlu0 %v388_v19, %s1392_s6 }
  0x6d   : > { %334 = vrot.lane.b32.xlu1 %v302_v0, %s1385_s21  ;;  %318 = vrot.lane.b32.xlu0 %v282_v1, %s1385_s21  ;;  %v288_v0 = vrot.slane %v209_v60, 1 }
  0x6f   : > { %v289_v4 = vsel %vm269_vm1, %v286_v49, %v288_v0  ;;  %v1788_v49 = vld [vmem:[%s1433_s20 + $0xc8] sm:$0xff] }
  0x71   : > { %576 = vrot.lane.b32.xlu1 %v304_v9, %s1388_s24  ;;  %560 = vrot.lane.b32.xlu0 %v284_v12, %s1388_s24 }
  0x75   : > { %644 = vrot.lane.b32.xlu1 %v408_v18, %s1389_s25  ;;  %628 = vrot.lane.b32.xlu0 %v388_v19, %s1389_s25 }
  0x79   : > { %850 = vrot.lane.b32.xlu1 %v410_v37, %s1392_s6  ;;  %834 = vrot.lane.b32.xlu0 %v390_v38, %s1392_s6 }
  0x7d   : > { %336 = vrot.lane.b32.xlu1 %v304_v9, %s1385_s21  ;;  %320 = vrot.lane.b32.xlu0 %v284_v12, %s1385_s21  ;;  %v392_v9 = vrot.slane %v1533_v31, 2 }
  0x7f   : > { %v395_v26 = vsel %vm375_vm2, %v392_v9, %v394_v20 }
  0x81   : > { %440 = vrot.lane.b32.xlu1 %v408_v18, %s1386_s22  ;;  %424 = vrot.lane.b32.xlu0 %v388_v19, %s1386_s22  ;;  %v414_v19 = vrot.slane %v221_v59, 2 }
  0x83   : > { %v415_v25 = vsel %vm375_vm2, %v412_v7, %v414_v19  ;;  %v225_v19 = vld [vmem:[%s1433_s20 + $0xd8] sm:$0xff] }
  0x85   : > { %646 = vrot.lane.b32.xlu1 %v410_v37, %s1389_s25  ;;  %630 = vrot.lane.b32.xlu0 %v390_v38, %s1389_s25 }
  0x87   : > { %v313_v39 = vpop.permute.xlu1 %312  ;;  %v311_v40 = vpop.permute.xlu0 %310 }
  0x88   : > { %360 = vst.msk [vmem:[#allocation2 + $0x8] sm:$0xff] %vm358_vm6, %v313_v39  ;;  %359 = vst.msk [vmem:[#allocation2] sm:$0xff] %vm358_vm6, %v311_v40 }
  0x89   : > { %711 = vrot.lane.b32.xlu1 %v1514_v28, %s1390_s26  ;;  %695 = vrot.lane.b32.xlu0 %v1517_v29, %s1390_s26 }
  0x8b   : > { %v329_v41 = vpop.permute.xlu1 %328  ;;  %v327_v43 = vpop.permute.xlu0 %326 }
  0x8c   : > { %368 = vst.msk [vmem:[#allocation2 + $0x48] sm:$0xff] %vm358_vm6, %v329_v41  ;;  %367 = vst.msk [vmem:[#allocation2 + $0x40] sm:$0xff] %vm358_vm6, %v327_v43  ;;  %v1775_v41 = vld [vmem:[%s1433_s20 + $0xc0] sm:$0xff] }
  0x8d   : > { %442 = vrot.lane.b32.xlu1 %v410_v37, %s1386_s22  ;;  %426 = vrot.lane.b32.xlu0 %v390_v38, %s1386_s22 }
  0x8f   : > { %v433_v44 = vpop.permute.xlu1 %432  ;;  %v417_v45 = vpop.permute.xlu0 %416 }
  0x90   : > { %473 = vst.msk [vmem:[#allocation2 + $0x40] sm:$0xff] %vm464_vm7, %v433_v44  ;;  %465 = vst.msk [vmem:[#allocation2] sm:$0xff] %vm464_vm7, %v417_v45 }
  0x91   : > { %507 = vrot.lane.b32.xlu1 %v1514_v28, %s1387_s23  ;;  %491 = vrot.lane.b32.xlu0 %v1517_v29, %s1387_s23  ;;  %v393_v28 = vsel %vm375_vm2, %v391_v8, %v392_v9 }
  0x93   : > { %v435_v51 = vpop.permute.xlu1 %434  ;;  %v419_v52 = vpop.permute.xlu0 %418 }
  0x94   : > { %474 = vst.msk [vmem:[#allocation2 + $0x48] sm:$0xff] %vm464_vm7, %v435_v51  ;;  %466 = vst.msk [vmem:[#allocation2 + $0x8] sm:$0xff] %vm464_vm7, %v419_v52  ;;  %v549_v51 = vrot.slane %v1775_v41, 1  ;;  %v550_v52 = vrot.slane %v1788_v49, 1 }
  0x95   : > { %713 = vrot.lane.b32.xlu1 %v1520_v30, %s1390_s26  ;;  %697 = vrot.lane.b32.xlu0 %v1533_v31, %s1390_s26 }
  0x97   : > { %v500_v56 = vpop.permute.xlu1 %499  ;;  %v484_v57 = vpop.permute.xlu0 %483 }
  0x98   : > { %540 = vst.msk [vmem:[#allocation2 + $0x40] sm:$0xff] %vm531_vm8, %v500_v56  ;;  %532 = vst.msk [vmem:[#allocation2] sm:$0xff] %vm531_vm8, %v484_v57  ;;  %v551_v56 = vsel %vm269_vm1, %v549_v51, %v550_v52 }
  0x99   : > { %782 = vrot.lane.b32.xlu1 %v307_v53, %s1391_s27  ;;  %766 = vrot.lane.b32.xlu0 %v287_v55, %s1391_s27 }
  0x9b   : > { %v502_v61 = vpop.permute.xlu1 %501  ;;  %v486_v62 = vpop.permute.xlu0 %485 }
  0x9c   : > { %541 = vst.msk [vmem:[#allocation2 + $0x48] sm:$0xff] %vm531_vm8, %v502_v61  ;;  %533 = vst.msk [vmem:[#allocation2 + $0x8] sm:$0xff] %vm531_vm8, %v486_v62  ;;  %v224_v61 = vld [vmem:[%s1433_s20 + $0xd0] sm:$0x3] }
  0x9d   : > { %509 = vrot.lane.b32.xlu1 %v1520_v30, %s1387_s23  ;;  %493 = vrot.lane.b32.xlu0 %v1533_v31, %s1387_s23  ;;  %v552_v62 = vrot.slane %v224_v61, 1 }
  0x9f   : > { %v571_v1 = vpop.permute.xlu1 %570  ;;  %v555_v2 = vpop.permute.xlu0 %554 }
  0xa0   : > { %611 = vst.msk [vmem:[#allocation2 + $0x40] sm:$0xff] %vm602_vm9, %v571_v1  ;;  %603 = vst.msk [vmem:[#allocation2] sm:$0xff] %vm602_vm9, %v555_v2  ;;  %v619_v1 = vrot.slane %v1775_v41, 2  ;;  %v620_v2 = vrot.slane %v1788_v49, 2 }
  0xa1   : > { %578 = vrot.lane.b32.xlu1 %v307_v53, %s1388_s24  ;;  %562 = vrot.lane.b32.xlu0 %v287_v55, %s1388_s24 }
  0xa3   : > { %v331_v12 = vpop.permute.xlu1 %330  ;;  %v315_v13 = vpop.permute.xlu0 %314 }
  0xa4   : > { %369 = vst.msk [vmem:[#allocation2 + $0x50] sm:$0xff] %vm358_vm6, %v331_v12  ;;  %361 = vst.msk [vmem:[#allocation2 + $0x10] sm:$0xff] %vm358_vm6, %v315_v13 }
  0xa5   : > { %784 = vrot.lane.b32.xlu1 %v309_v3, %s1391_s27  ;;  %768 = vrot.lane.b32.xlu0 %v289_v4, %s1391_s27 }
  0xa7   : > { %v573_v15 = vpop.permute.xlu1 %572  ;;  %v557_v30 = vpop.permute.xlu0 %556 }
  0xa8   : > { %612 = vst.msk [vmem:[#allocation2 + $0x48] sm:$0xff] %vm602_vm9, %v573_v15  ;;  %604 = vst.msk [vmem:[#allocation2 + $0x8] sm:$0xff] %vm602_vm9, %v557_v30 }
  0xa9   : > { %852 = vrot.lane.b32.xlu1 %v413_v14, %s1392_s6  ;;  %836 = vrot.lane.b32.xlu0 %v393_v28, %s1392_s6 }
  0xab   : > { %v641_v29 = vpop.permute.xlu1 %640  ;;  %v625_v31 = vpop.permute.xlu0 %624 }
  0xac   : > { %681 = vst.msk [vmem:[#allocation2 + $0x40] sm:$0xff] %vm672_vm10, %v641_v29  ;;  %673 = vst.msk [vmem:[#allocation2] sm:$0xff] %vm672_vm10, %v625_v31 }
  0xad   : > { %338 = vrot.lane.b32.xlu1 %v307_v53, %s1385_s21  ;;  %322 = vrot.lane.b32.xlu0 %v287_v55, %s1385_s21 }
  0xaf   : > { %v333_v17 = vpop.permute.xlu1 %332  ;;  %v317_v18 = vpop.permute.xlu0 %316 }
  0xb0   : > { %370 = vst.msk [vmem:[#allocation2 + $0x58] sm:$0xff] %vm358_vm6, %v333_v17  ;;  %362 = vst.msk [vmem:[#allocation2 + $0x18] sm:$0xff] %vm358_vm6, %v317_v18 }
  0xb1   : > { %580 = vrot.lane.b32.xlu1 %v309_v3, %s1388_s24  ;;  %564 = vrot.lane.b32.xlu0 %v289_v4, %s1388_s24 }
  0xb3   : > { %v437_v23 = vpop.permute.xlu1 %436  ;;  %v421_v24 = vpop.permute.xlu0 %420 }
  0xb4   : > { %475 = vst.msk [vmem:[#allocation2 + $0x50] sm:$0xff] %vm464_vm7, %v437_v23  ;;  %467 = vst.msk [vmem:[#allocation2 + $0x10] sm:$0xff] %vm464_vm7, %v421_v24  ;;  %v226_v24 = vld [vmem:[%s1433_s20 + $0xe0] sm:$0xff] }
  0xb5   : > { %648 = vrot.lane.b32.xlu1 %v413_v14, %s1389_s25  ;;  %632 = vrot.lane.b32.xlu0 %v393_v28, %s1389_s25 }
  0xb7   : > { %v643_v27 = vpop.permute.xlu1 %642  ;;  %v627_v33 = vpop.permute.xlu0 %626 }
  0xb8   : > { %682 = vst.msk [vmem:[#allocation2 + $0x48] sm:$0xff] %vm672_vm10, %v643_v27  ;;  %674 = vst.msk [vmem:[#allocation2 + $0x8] sm:$0xff] %vm672_vm10, %v627_v33 }
  0xb9   : > { %854 = vrot.lane.b32.xlu1 %v415_v25, %s1392_s6  ;;  %838 = vrot.lane.b32.xlu0 %v395_v26, %s1392_s6 }
  0xbb   : > { %v708_v34 = vpop.permute.xlu1 %707  ;;  %v692_v35 = vpop.permute.xlu0 %691 }
  0xbc   : > { %748 = vst.msk [vmem:[#allocation2 + $0x40] sm:$0xff] %vm739_vm11, %v708_v34  ;;  %740 = vst.msk [vmem:[#allocation2] sm:$0xff] %vm739_vm11, %v692_v35  ;;  %v227_v34 = vld [vmem:[%s1433_s20 + $0xe8] sm:$0x3] }
  0xbd   : > { %340 = vrot.lane.b32.xlu1 %v309_v3, %s1385_s21  ;;  %324 = vrot.lane.b32.xlu0 %v289_v4, %s1385_s21  ;;  %v553_v3 = vsel %vm269_vm1, %v550_v52, %v552_v62  ;;  %v760_v35 = vrot.slane %v227_v34, 1  ;;  %s1280_s21 = sshll.u32 %s2057_s16, 7 }
  0xbf   : > { %v439_v37 = vpop.permute.xlu1 %438  ;;  %v423_v38 = vpop.permute.xlu0 %422 }
  0xc0   : > { %476 = vst.msk [vmem:[#allocation2 + $0x58] sm:$0xff] %vm464_vm7, %v439_v37  ;;  %468 = vst.msk [vmem:[#allocation2 + $0x18] sm:$0xff] %vm464_vm7, %v423_v38 }
  0xc1   : > { %444 = vrot.lane.b32.xlu1 %v413_v14, %s1386_s22  ;;  %428 = vrot.lane.b32.xlu0 %v393_v28, %s1386_s22  ;;  %v622_v14 = vrot.slane %v224_v61, 2 }
  0xc3   : > { %v504_v39 = vpop.permute.xlu1 %503  ;;  %v488_v40 = vpop.permute.xlu0 %487  ;;  %v623_v30 = vsel %vm375_vm2, %v620_v2, %v622_v14 }
  0xc4   : > { %542 = vst.msk [vmem:[#allocation2 + $0x50] sm:$0xff] %vm531_vm8, %v504_v39  ;;  %534 = vst.msk [vmem:[#allocation2 + $0x10] sm:$0xff] %vm531_vm8, %v488_v40  ;;  %v828_v39 = vrot.slane %v226_v24, 2 }
  0xc5   : > { %650 = vrot.lane.b32.xlu1 %v415_v25, %s1389_s25  ;;  %634 = vrot.lane.b32.xlu0 %v395_v26, %s1389_s25 }
  0xc7   : > { %v710_v43 = vpop.permute.xlu1 %709  ;;  %v694_v44 = vpop.permute.xlu0 %693 }
  0xc8   : > { %749 = vst.msk [vmem:[#allocation2 + $0x48] sm:$0xff] %vm739_vm11, %v710_v43  ;;  %741 = vst.msk [vmem:[#allocation2 + $0x8] sm:$0xff] %vm739_vm11, %v694_v44  ;;  %v830_v44 = vrot.slane %v227_v34, 2 }
  0xc9   : > { %715 = vrot.lane.b32.xlu1 %v1775_v41, %s1390_s26  ;;  %699 = vrot.lane.b32.xlu0 %v1453_v10, %s1390_s26 }
  0xcb   : > { %v779_v45 = vpop.permute.xlu1 %778  ;;  %v763_v46 = vpop.permute.xlu0 %762 }
  0xcc   : > { %819 = vst.msk [vmem:[#allocation2 + $0x40] sm:$0xff] %vm810_vm12, %v779_v45  ;;  %811 = vst.msk [vmem:[#allocation2] sm:$0xff] %vm810_vm12, %v763_v46  ;;  %v831_v46 = vsel %vm375_vm2, %v828_v39, %v830_v44 }
  0xcd   : > { %446 = vrot.lane.b32.xlu1 %v415_v25, %s1386_s22  ;;  %430 = vrot.lane.b32.xlu0 %v395_v26, %s1386_s22  ;;  %v757_v25 = vrot.slane %v225_v19, 1  ;;  %v758_v26 = vrot.slane %v226_v24, 1 }
  0xcf   : > { %v506_v47 = vpop.permute.xlu1 %505  ;;  %v490_v48 = vpop.permute.xlu0 %489  ;;  %v761_v40 = vsel %vm269_vm1, %v758_v26, %v760_v35 }
  0xd0   : > { %543 = vst.msk [vmem:[#allocation2 + $0x58] sm:$0xff] %vm531_vm8, %v506_v47  ;;  %535 = vst.msk [vmem:[#allocation2 + $0x18] sm:$0xff] %vm531_vm8, %v490_v48 }
  0xd1   : > { %511 = vrot.lane.b32.xlu1 %v1775_v41, %s1387_s23  ;;  %495 = vrot.lane.b32.xlu0 %v1453_v10, %s1387_s23 }
  0xd3   : > { %v575_v53 = vpop.permute.xlu1 %574  ;;  %v559_v55 = vpop.permute.xlu0 %558 }
  0xd4   : > { %613 = vst.msk [vmem:[#allocation2 + $0x50] sm:$0xff] %vm602_vm9, %v575_v53  ;;  %605 = vst.msk [vmem:[#allocation2 + $0x10] sm:$0xff] %vm602_vm9, %v559_v55 }
  0xd5   : > { %717 = vrot.lane.b32.xlu1 %v1788_v49, %s1390_s26  ;;  %701 = vrot.lane.b32.xlu0 %v1445_v6, %s1390_s26 }
  0xd7   : > { %v781_v10 = vpop.permute.xlu1 %780  ;;  %v765_v57 = vpop.permute.xlu0 %764 }
  0xd8   : > { %820 = vst.msk [vmem:[#allocation2 + $0x48] sm:$0xff] %vm810_vm12, %v781_v10  ;;  %812 = vst.msk [vmem:[#allocation2 + $0x8] sm:$0xff] %vm810_vm12, %v765_v57 }
  0xd9   : > { %786 = vrot.lane.b32.xlu1 %v551_v56, %s1391_s27  ;;  %770 = vrot.lane.b32.xlu0 %v1492_v22, %s1391_s27 }
  0xdb   : > { %v849_v59 = vpop.permute.xlu1 %848  ;;  %v833_v60 = vpop.permute.xlu0 %832 }
  0xdc   : > { %889 = vst.msk [vmem:[#allocation2 + $0x40] sm:$0xff] %vm880_vm13, %v849_v59  ;;  %881 = vst.msk [vmem:[#allocation2] sm:$0xff] %vm880_vm13, %v833_v60 }
  0xdd   : > { %513 = vrot.lane.b32.xlu1 %v1788_v49, %s1387_s23  ;;  %497 = vrot.lane.b32.xlu0 %v1445_v6, %s1387_s23 }
  0xdf   : > { %v335_v63 = vpop.permute.xlu1 %334  ;;  %v319_v0 = vpop.permute.xlu0 %318 }
  0xe0   : > { %371 = vst.msk [vmem:[#allocation2 + $0x60] sm:$0xff] %vm358_vm6, %v335_v63  ;;  %363 = vst.msk [vmem:[#allocation2 + $0x20] sm:$0xff] %vm358_vm6, %v319_v0 }
  0xe1   : > { %582 = vrot.lane.b32.xlu1 %v551_v56, %s1388_s24  ;;  %566 = vrot.lane.b32.xlu0 %v1492_v22, %s1388_s24  ;;  %v621_v22 = vsel %vm375_vm2, %v619_v1, %v620_v2 }
  0xe3   : > { %v577_v6 = vpop.permute.xlu1 %576  ;;  %v561_v4 = vpop.permute.xlu0 %560  ;;  %v897_v5 = vld [vmem:[#allocation2] sm:$0xff] }
  0xe4   : > { %v905_v7 = vld [vmem:[#allocation2 + $0x40] sm:$0xff]  ;;  %614 = vst.msk [vmem:[#allocation2 + $0x58] sm:$0xff] %vm602_vm9, %v577_v6  ;;  %606 = vst.msk [vmem:[#allocation2 + $0x18] sm:$0xff] %vm602_vm9, %v561_v4  ;;  %1315 = vmatprep.mubr.msk.f32.mxu0 %vm919_vm14, %v897_v5 }
  0xe5   : > { %1327 = vmatprep.mubr.msk.f32.mxu1 %vm919_vm14, %v905_v7  ;;  %788 = vrot.lane.b32.xlu1 %v553_v3, %s1391_s27 }
  0xe6   : > { %772 = vrot.lane.b32.xlu0 %v1489_v21, %s1391_s27 }
  0xe7   : > { %v645_v8 = vpop.permute.xlu1 %644  ;;  %v629_v9 = vpop.permute.xlu0 %628 }
  0xe8   : > { %683 = vst.msk [vmem:[#allocation2 + $0x50] sm:$0xff] %vm672_vm10, %v645_v8  ;;  %675 = vst.msk [vmem:[#allocation2 + $0x10] sm:$0xff] %vm672_vm10, %v629_v9 }
  0xe9   : > { %856 = vrot.lane.b32.xlu1 %v621_v22, %s1392_s6 }
  0xea   : > { %840 = vrot.lane.b32.xlu0 %v1536_v32, %s1392_s6 }
  0xeb   : > { %v851_v12 = vpop.permute.xlu1 %850  ;;  %v835_v13 = vpop.permute.xlu0 %834 }
  0xec   : > { %890 = vst.msk [vmem:[#allocation2 + $0x48] sm:$0xff] %vm880_vm13, %v851_v12  ;;  %882 = vst.msk [vmem:[#allocation2 + $0x8] sm:$0xff] %vm880_vm13, %v835_v13 }
  0xed   : > { %584 = vrot.lane.b32.xlu1 %v553_v3, %s1388_s24 }
  0xee   : > { %568 = vrot.lane.b32.xlu0 %v1489_v21, %s1388_s24  ;;  %s1988_s24 = scalar_lea.vmem %s2055_s4, %s1280_s21 }
  0xef   : > { %v337_v28 = vpop.permute.xlu1 %336  ;;  %v321_v15 = vpop.permute.xlu0 %320 }
  0xf0   : > { %372 = vst.msk [vmem:[#allocation2 + $0x68] sm:$0xff] %vm358_vm6, %v337_v28  ;;  %364 = vst.msk [vmem:[#allocation2 + $0x28] sm:$0xff] %vm358_vm6, %v321_v15 }
  0xf1   : > { %652 = vrot.lane.b32.xlu1 %v621_v22, %s1389_s25 }
  0xf2   : > { %636 = vrot.lane.b32.xlu0 %v1536_v32, %s1389_s25 }
  0xf3   : > { %v441_v29 = vpop.permute.xlu1 %440  ;;  %v425_v31 = vpop.permute.xlu0 %424  ;;  %v898_v17 = vld [vmem:[#allocation2 + $0x8] sm:$0xff] }
  0xf4   : > { %v906_v18 = vld [vmem:[#allocation2 + $0x48] sm:$0xff]  ;;  %477 = vst.msk [vmem:[#allocation2 + $0x60] sm:$0xff] %vm464_vm7, %v441_v29  ;;  %469 = vst.msk [vmem:[#allocation2 + $0x20] sm:$0xff] %vm464_vm7, %v425_v31  ;;  %1316 = vmatmul.mubr.msk.f32.vlgmr.msra.gmra.mrb[0].mxu0 %vm919_vm14, %v898_v17 }
  0xf5   : > { %1328 = vmatmul.mubr.msk.f32.vlgmr.msra.gmra.mrb[0].mxu1 %vm919_vm14, %v906_v18  ;;  %858 = vrot.lane.b32.xlu1 %v623_v30, %s1392_s6 }
  0xf6   : > { %842 = vrot.lane.b32.xlu0 %v1546_v36, %s1392_s6 }
  0xf7   : > { %v647_v21 = vpop.permute.xlu1 %646  ;;  %v631_v32 = vpop.permute.xlu0 %630 }
  0xf8   : > { %684 = vst.msk [vmem:[#allocation2 + $0x58] sm:$0xff] %vm672_vm10, %v647_v21  ;;  %676 = vst.msk [vmem:[#allocation2 + $0x18] sm:$0xff] %vm672_vm10, %v631_v32 }
  0xf9   : > { %654 = vrot.lane.b32.xlu1 %v623_v30, %s1389_s25 }
  0xfa   : > { %638 = vrot.lane.b32.xlu0 %v1546_v36, %s1389_s25  ;;  %v759_v36 = vsel %vm269_vm1, %v757_v25, %v758_v26 }
  0xfb   : > { %v712_v20 = vpop.permute.xlu1 %711  ;;  %v696_v23 = vpop.permute.xlu0 %695 }
  0xfc   : > { %750 = vst.msk [vmem:[#allocation2 + $0x50] sm:$0xff] %vm739_vm11, %v712_v20  ;;  %742 = vst.msk [vmem:[#allocation2 + $0x10] sm:$0xff] %vm739_vm11, %v696_v23 }
  0xfd   : > { %719 = vrot.lane.b32.xlu1 %v225_v19, %s1390_s26 }
  0xfe   : > { %703 = vrot.lane.b32.xlu0 %v1456_v11, %s1390_s26  ;;  %v827_v11 = vrot.slane %v225_v19, 2 }
  0xff   : > { %v443_v27 = vpop.permute.xlu1 %442  ;;  %v427_v33 = vpop.permute.xlu0 %426 }
 0x100   : > { %478 = vst.msk [vmem:[#allocation2 + $0x68] sm:$0xff] %vm464_vm7, %v443_v27  ;;  %470 = vst.msk [vmem:[#allocation2 + $0x28] sm:$0xff] %vm464_vm7, %v427_v33  ;;  %v829_v43 = vsel %vm375_vm2, %v827_v11, %v828_v39 }
 0x101   : > { %721 = vrot.lane.b32.xlu1 %v226_v24, %s1390_s26 }
 0x102   : > { %705 = vrot.lane.b32.xlu0 %v1467_v16, %s1390_s26 }
 0x103   : > { %v508_v37 = vpop.permute.xlu1 %507  ;;  %v492_v38 = vpop.permute.xlu0 %491 }
 0x104   : > { %544 = vst.msk [vmem:[#allocation2 + $0x60] sm:$0xff] %vm531_vm8, %v508_v37  ;;  %536 = vst.msk [vmem:[#allocation2 + $0x20] sm:$0xff] %vm531_vm8, %v492_v38 }
 0x105   : > { %790 = vrot.lane.b32.xlu1 %v759_v36, %s1391_s27 }
 0x106   : > { %774 = vrot.lane.b32.xlu0 %v1565_v42, %s1391_s27 }
 0x107   : > { %v714_v41 = vpop.permute.xlu1 %713  ;;  %v698_v16 = vpop.permute.xlu0 %697 }
 0x108   : > { %751 = vst.msk [vmem:[#allocation2 + $0x58] sm:$0xff] %vm739_vm11, %v714_v41  ;;  %743 = vst.msk [vmem:[#allocation2 + $0x18] sm:$0xff] %vm739_vm11, %v698_v16 }
 0x109   : > { %792 = vrot.lane.b32.xlu1 %v761_v40, %s1391_s27 }
 0x10a   : > { %776 = vrot.lane.b32.xlu0 %v1579_v50, %s1391_s27 }
 0x10b   : > { %v783_v45 = vpop.permute.xlu1 %782  ;;  %v767_v42 = vpop.permute.xlu0 %766 }
 0x10c   : > { %821 = vst.msk [vmem:[#allocation2 + $0x50] sm:$0xff] %vm810_vm12, %v783_v45  ;;  %813 = vst.msk [vmem:[#allocation2 + $0x10] sm:$0xff] %vm810_vm12, %v767_v42 }
 0x10d   : > { %860 = vrot.lane.b32.xlu1 %v829_v43, %s1392_s6 }
 0x10e   : > { %844 = vrot.lane.b32.xlu0 %v1588_v54, %s1392_s6 }
 0x10f   : > { %v510_v47 = vpop.permute.xlu1 %509  ;;  %v494_v48 = vpop.permute.xlu0 %493 }
 0x110   : > { %545 = vst.msk [vmem:[#allocation2 + $0x68] sm:$0xff] %vm531_vm8, %v510_v47  ;;  %537 = vst.msk [vmem:[#allocation2 + $0x28] sm:$0xff] %vm531_vm8, %v494_v48 }
 0x111   : > { %862 = vrot.lane.b32.xlu1 %v831_v46, %s1392_s6 }
 0x112   : > { %846 = vrot.lane.b32.xlu0 %v1601_v58, %s1392_s6 }
 0x113   : > { %v579_v50 = vpop.permute.xlu1 %578  ;;  %v563_v49 = vpop.permute.xlu0 %562 }
 0x114   : > { %615 = vst.msk [vmem:[#allocation2 + $0x60] sm:$0xff] %vm602_vm9, %v579_v50  ;;  %607 = vst.msk [vmem:[#allocation2 + $0x20] sm:$0xff] %vm602_vm9, %v563_v49 }
 0x117   : > { %v785_v54 = vpop.permute.xlu1 %784  ;;  %v769_v51 = vpop.permute.xlu0 %768 }
 0x118   : > { %822 = vst.msk [vmem:[#allocation2 + $0x58] sm:$0xff] %vm810_vm12, %v785_v54  ;;  %814 = vst.msk [vmem:[#allocation2 + $0x18] sm:$0xff] %vm810_vm12, %v769_v51 }
 0x11b   : > { %v853_v52 = vpop.permute.xlu1 %852  ;;  %v837_v53 = vpop.permute.xlu0 %836 }
 0x11c   : > { %891 = vst.msk [vmem:[#allocation2 + $0x50] sm:$0xff] %vm880_vm13, %v853_v52  ;;  %883 = vst.msk [vmem:[#allocation2 + $0x10] sm:$0xff] %vm880_vm13, %v837_v53 }
 0x11f   : > { %v339_v55 = vpop.permute.xlu1 %338  ;;  %v323_v58 = vpop.permute.xlu0 %322 }
 0x120   : > { %373 = vst.msk [vmem:[#allocation2 + $0x70] sm:$0xff] %vm358_vm6, %v339_v55  ;;  %365 = vst.msk [vmem:[#allocation2 + $0x30] sm:$0xff] %vm358_vm6, %v323_v58  ;;  %v1971_v55 = vld [vmem:[%s2053_s2] ss:$0 sm:$0xff] }
 0x123   : > { %v581_v56 = vpop.permute.xlu1 %580  ;;  %v565_v10 = vpop.permute.xlu0 %564  ;;  %v899_v57 = vld [vmem:[#allocation2 + $0x10] sm:$0xff] }
 0x124   : > { %v907_v59 = vld [vmem:[#allocation2 + $0x50] sm:$0xff]  ;;  %616 = vst.msk [vmem:[#allocation2 + $0x68] sm:$0xff] %vm602_vm9, %v581_v56  ;;  %608 = vst.msk [vmem:[#allocation2 + $0x28] sm:$0xff] %vm602_vm9, %v565_v10  ;;  %1318 = vmatprep.mubr.msk.f32.mxu0 %vm919_vm14, %v899_v57  ;;  %v1976_v56 = vld [vmem:[%s2054_s3] ss:$0 sm:$0xff] }
 0x125   : > { %1330 = vmatprep.mubr.msk.f32.mxu1 %vm919_vm14, %v907_v59 }
 0x127   : > { %v649_v60 = vpop.permute.xlu1 %648  ;;  %v633_v61 = vpop.permute.xlu0 %632 }
 0x128   : > { %685 = vst.msk [vmem:[#allocation2 + $0x60] sm:$0xff] %vm672_vm10, %v649_v60  ;;  %677 = vst.msk [vmem:[#allocation2 + $0x20] sm:$0xff] %vm672_vm10, %v633_v61 }
 0x12b   : > { %v855_v62 = vpop.permute.xlu1 %854  ;;  %v839_v63 = vpop.permute.xlu0 %838 }
 0x12c   : > { %892 = vst.msk [vmem:[#allocation2 + $0x58] sm:$0xff] %vm880_vm13, %v855_v62  ;;  %884 = vst.msk [vmem:[#allocation2 + $0x18] sm:$0xff] %vm880_vm13, %v839_v63 }
 0x12f   : > { %v341_v0 = vpop.permute.xlu1 %340  ;;  %v325_v1 = vpop.permute.xlu0 %324 }
 0x130   : > { %374 = vst.msk [vmem:[#allocation2 + $0x78] sm:$0xff] %vm358_vm6, %v341_v0  ;;  %366 = vst.msk [vmem:[#allocation2 + $0x38] sm:$0xff] %vm358_vm6, %v325_v1 }
 0x133   : > { %v445_v2 = vpop.permute.xlu1 %444  ;;  %v429_v3 = vpop.permute.xlu0 %428  ;;  %v900_v6 = vld [vmem:[#allocation2 + $0x18] sm:$0xff] }
 0x134   : > { %v908_v4 = vld [vmem:[#allocation2 + $0x58] sm:$0xff]  ;;  %479 = vst.msk [vmem:[#allocation2 + $0x70] sm:$0xff] %vm464_vm7, %v445_v2  ;;  %471 = vst.msk [vmem:[#allocation2 + $0x30] sm:$0xff] %vm464_vm7, %v429_v3  ;;  %1319 = vmatmul.mubr.msk.f32.gmra.mrb[2].mxu0 %vm919_vm14, %v900_v6 }
 0x135   : > { %1331 = vmatmul.mubr.msk.f32.gmra.mrb[2].mxu1 %vm919_vm14, %v908_v4 }
 0x137   : > { %v651_v5 = vpop.permute.xlu1 %650  ;;  %v635_v7 = vpop.permute.xlu0 %634 }
 0x138   : > { %686 = vst.msk [vmem:[#allocation2 + $0x68] sm:$0xff] %vm672_vm10, %v651_v5  ;;  %678 = vst.msk [vmem:[#allocation2 + $0x28] sm:$0xff] %vm672_vm10, %v635_v7 }
 0x13b   : > { %v716_v22 = vpop.permute.xlu1 %715  ;;  %v700_v8 = vpop.permute.xlu0 %699 }
 0x13c   : > { %752 = vst.msk [vmem:[#allocation2 + $0x60] sm:$0xff] %vm739_vm11, %v716_v22  ;;  %744 = vst.msk [vmem:[#allocation2 + $0x20] sm:$0xff] %vm739_vm11, %v700_v8 }
 0x13f   : > { %v447_v9 = vpop.permute.xlu1 %446  ;;  %v431_v12 = vpop.permute.xlu0 %430 }
 0x140   : > { %480 = vst.msk [vmem:[#allocation2 + $0x78] sm:$0xff] %vm464_vm7, %v447_v9  ;;  %472 = vst.msk [vmem:[#allocation2 + $0x38] sm:$0xff] %vm464_vm7, %v431_v12 }
 0x143   : > { %v512_v13 = vpop.permute.xlu1 %511  ;;  %v496_v14 = vpop.permute.xlu0 %495 }
 0x144   : > { %546 = vst.msk [vmem:[#allocation2 + $0x70] sm:$0xff] %vm531_vm8, %v512_v13  ;;  %538 = vst.msk [vmem:[#allocation2 + $0x30] sm:$0xff] %vm531_vm8, %v496_v14 }
 0x147   : > { %v718_v28 = vpop.permute.xlu1 %717  ;;  %v702_v15 = vpop.permute.xlu0 %701 }
 0x148   : > { %753 = vst.msk [vmem:[#allocation2 + $0x68] sm:$0xff] %vm739_vm11, %v718_v28  ;;  %745 = vst.msk [vmem:[#allocation2 + $0x28] sm:$0xff] %vm739_vm11, %v702_v15 }
 0x14b   : > { %v787_v30 = vpop.permute.xlu1 %786  ;;  %v771_v29 = vpop.permute.xlu0 %770 }
 0x14c   : > { %823 = vst.msk [vmem:[#allocation2 + $0x60] sm:$0xff] %vm810_vm12, %v787_v30  ;;  %815 = vst.msk [vmem:[#allocation2 + $0x20] sm:$0xff] %vm810_vm12, %v771_v29 }
 0x14f   : > { %v514_v31 = vpop.permute.xlu1 %513  ;;  %v498_v17 = vpop.permute.xlu0 %497 }
 0x150   : > { %547 = vst.msk [vmem:[#allocation2 + $0x78] sm:$0xff] %vm531_vm8, %v514_v31  ;;  %539 = vst.msk [vmem:[#allocation2 + $0x38] sm:$0xff] %vm531_vm8, %v498_v17 }
 0x153   : > { %v583_v18 = vpop.permute.xlu1 %582  ;;  %v567_v21 = vpop.permute.xlu0 %566 }
 0x154   : > { %617 = vst.msk [vmem:[#allocation2 + $0x70] sm:$0xff] %vm602_vm9, %v583_v18  ;;  %609 = vst.msk [vmem:[#allocation2 + $0x30] sm:$0xff] %vm602_vm9, %v567_v21 }
 0x157   : > { %v789_v32 = vpop.permute.xlu1 %788 }
 0x158   : > { %v773_v19 = vpop.permute.xlu0 %772  ;;  %824 = vst.msk [vmem:[#allocation2 + $0x68] sm:$0xff] %vm810_vm12, %v789_v32 }
 0x159   : > { %816 = vst.msk [vmem:[#allocation2 + $0x28] sm:$0xff] %vm810_vm12, %v773_v19 }
 0x15b   : > { %v857_v20 = vpop.permute.xlu1 %856 }
 0x15c   : > { %v841_v23 = vpop.permute.xlu0 %840  ;;  %893 = vst.msk [vmem:[#allocation2 + $0x60] sm:$0xff] %vm880_vm13, %v857_v20 }
 0x15d   : > { %885 = vst.msk [vmem:[#allocation2 + $0x20] sm:$0xff] %vm880_vm13, %v841_v23 }
 0x15f   : > { %v585_v24 = vpop.permute.xlu1 %584 }
 0x160   : > { %v569_v25 = vpop.permute.xlu0 %568  ;;  %618 = vst.msk [vmem:[#allocation2 + $0x78] sm:$0xff] %vm602_vm9, %v585_v24 }
 0x161   : > { %610 = vst.msk [vmem:[#allocation2 + $0x38] sm:$0xff] %vm602_vm9, %v569_v25 }
 0x163   : > { %v653_v26 = vpop.permute.xlu1 %652  ;;  %v909_v34 = vld [vmem:[#allocation2 + $0x60] sm:$0xff] }
 0x164   : > { %v637_v27 = vpop.permute.xlu0 %636  ;;  %v901_v33 = vld [vmem:[#allocation2 + $0x20] sm:$0xff]  ;;  %687 = vst.msk [vmem:[#allocation2 + $0x70] sm:$0xff] %vm672_vm10, %v653_v26  ;;  %1333 = vmatprep.mubr.msk.f32.mxu1 %vm919_vm14, %v909_v34 }
 0x165   : > { %679 = vst.msk [vmem:[#allocation2 + $0x30] sm:$0xff] %vm672_vm10, %v637_v27  ;;  %1321 = vmatprep.mubr.msk.f32.mxu0 %vm919_vm14, %v901_v33 }
 0x167   : > { %v859_v36 = vpop.permute.xlu1 %858 }
 0x168   : > { %v843_v35 = vpop.permute.xlu0 %842  ;;  %894 = vst.msk [vmem:[#allocation2 + $0x68] sm:$0xff] %vm880_vm13, %v859_v36 }
 0x169   : > { %886 = vst.msk [vmem:[#allocation2 + $0x28] sm:$0xff] %vm880_vm13, %v843_v35 }
 0x16b   : > { %v655_v37 = vpop.permute.xlu1 %654 }
 0x16c   : > { %v639_v38 = vpop.permute.xlu0 %638  ;;  %688 = vst.msk [vmem:[#allocation2 + $0x78] sm:$0xff] %vm672_vm10, %v655_v37 }
 0x16d   : > { %680 = vst.msk [vmem:[#allocation2 + $0x38] sm:$0xff] %vm672_vm10, %v639_v38 }
 0x16f   : > { %v720_v11 = vpop.permute.xlu1 %719  ;;  %v910_v41 = vld [vmem:[#allocation2 + $0x68] sm:$0xff] }
 0x170   : > { %v704_v39 = vpop.permute.xlu0 %703  ;;  %v902_v40 = vld [vmem:[#allocation2 + $0x28] sm:$0xff]  ;;  %754 = vst.msk [vmem:[#allocation2 + $0x70] sm:$0xff] %vm739_vm11, %v720_v11  ;;  %1334 = vmatmul.mubr.msk.f32.gmra.mrb[4].mxu1 %vm919_vm14, %v910_v41 }
 0x171   : > { %746 = vst.msk [vmem:[#allocation2 + $0x30] sm:$0xff] %vm739_vm11, %v704_v39  ;;  %1322 = vmatmul.mubr.msk.f32.gmra.mrb[4].mxu0 %vm919_vm14, %v902_v40 }
 0x173   : > { %v722_v16 = vpop.permute.xlu1 %721 }
 0x174   : > { %v706_v43 = vpop.permute.xlu0 %705  ;;  %755 = vst.msk [vmem:[#allocation2 + $0x78] sm:$0xff] %vm739_vm11, %v722_v16 }
 0x175   : > { %747 = vst.msk [vmem:[#allocation2 + $0x38] sm:$0xff] %vm739_vm11, %v706_v43 }
 0x177   : > { %v791_v44 = vpop.permute.xlu1 %790 }
 0x178   : > { %v775_v45 = vpop.permute.xlu0 %774  ;;  %825 = vst.msk [vmem:[#allocation2 + $0x70] sm:$0xff] %vm810_vm12, %v791_v44 }
 0x179   : > { %817 = vst.msk [vmem:[#allocation2 + $0x30] sm:$0xff] %vm810_vm12, %v775_v45 }
 0x17b   : > { %v793_v42 = vpop.permute.xlu1 %792 }
 0x17c   : > { %v777_v46 = vpop.permute.xlu0 %776  ;;  %826 = vst.msk [vmem:[#allocation2 + $0x78] sm:$0xff] %vm810_vm12, %v793_v42 }
 0x17d   : > { %818 = vst.msk [vmem:[#allocation2 + $0x38] sm:$0xff] %vm810_vm12, %v777_v46 }
 0x17f   : > { %v861_v47 = vpop.permute.xlu1 %860 }
 0x180   : > { %v845_v48 = vpop.permute.xlu0 %844  ;;  %895 = vst.msk [vmem:[#allocation2 + $0x70] sm:$0xff] %vm880_vm13, %v861_v47 }
 0x181   : > { %887 = vst.msk [vmem:[#allocation2 + $0x30] sm:$0xff] %vm880_vm13, %v845_v48 }
 0x183   : > { %v863_v50 = vpop.permute.xlu1 %862 }
 0x184   : > { %v847_v49 = vpop.permute.xlu0 %846  ;;  %896 = vst.msk [vmem:[#allocation2 + $0x78] sm:$0xff] %vm880_vm13, %v863_v50 }
 0x185   : > { %888 = vst.msk [vmem:[#allocation2 + $0x38] sm:$0xff] %vm880_vm13, %v847_v49 }
 0x187   : > { %v911_v51 = vld [vmem:[#allocation2 + $0x70] sm:$0xff] }
 0x188   : > { %v903_v54 = vld [vmem:[#allocation2 + $0x30] sm:$0xff]  ;;  %1336 = vmatprep.mubr.msk.f32.mxu1 %vm919_vm14, %v911_v51 }
 0x189   : > { %1324 = vmatprep.mubr.msk.f32.mxu0 %vm919_vm14, %v903_v54 }
 0x18b   : > { %v912_v53 = vld [vmem:[#allocation2 + $0x78] sm:$0xff] }
 0x18c   : > { %v904_v52 = vld [vmem:[#allocation2 + $0x38] sm:$0xff]  ;;  %1337 = vmatmul.mubr.msk.f32.gmra.mrb[6].mxu1 %vm919_vm14, %v912_v53 }
 0x18d   : > { %1325 = vmatmul.mubr.msk.f32.gmra.mrb[6].mxu0 %vm919_vm14, %v904_v52 }
 0x1c7   : > { %v1317_v58 = vpop.f32.mrb[0].mxu0 }
 0x1c8   : > { %v1329_v10 = vpop.f32.mrb[0].mxu1  ;;  %v1125_v57 = vmul.f32 %v1317_v58, %v1971_v55  ;;  %v1038_v60 = vpop.f32.mrb[1].mxu0 }
 0x1c9   : > { %v1133_v59 = vmul.f32 %v1329_v10, %v1971_v55  ;;  %v1078_v61 = vpop.f32.mrb[1].mxu1  ;;  %v1124_v62 = vmul.f32 %v1971_v55, %v1038_v60 }
 0x1ca   : > { %v1132_v63 = vmul.f32 %v1971_v55, %v1078_v61  ;;  %v1148_v0 = vadd.f32 %v1976_v56, %v1125_v57 }
 0x1cb   : > { %v1156_v1 = vadd.f32 %v1976_v56, %v1133_v59  ;;  %v1147_v2 = vadd.f32 %v1976_v56, %v1124_v62 }
 0x1cc   : > { %v1155_v3 = vadd.f32 %v1976_v56, %v1132_v63  ;;  %v1164_v6 = vmax.f32 %v1148_v0, 0.0 }
 0x1cd   : > { %v1172_v4 = vmax.f32 %v1156_v1, 0.0  ;;  %v1163_v5 = vmax.f32 %v1147_v2, 0.0 }
 0x1ce   : > { %v1171_v7 = vmax.f32 %v1155_v3, 0.0  ;;  %1181 = vst.msk [vmem:[%s1988_s24 + $0x8] sm:$0xff] %vm1179_vm15, %v1164_v6 }
 0x1cf   : > { %1189 = vst.msk [vmem:[%s1988_s24 + $0x48] sm:$0xff] %vm1179_vm15, %v1172_v4  ;;  %1180 = vst.msk [vmem:[%s1988_s24] sm:$0xff] %vm1179_vm15, %v1163_v5 }
 0x1d0   : > { %1188 = vst.msk [vmem:[%s1988_s24 + $0x40] sm:$0xff] %vm1179_vm15, %v1171_v7 }
 0x207   : > { %v1320_v22 = vpop.f32.mrb[2].mxu0 }
 0x208   : > { %v1332_v8 = vpop.f32.mrb[2].mxu1  ;;  %v1127_v9 = vmul.f32 %v1320_v22, %v1971_v55  ;;  %v1048_v13 = vpop.f32.mrb[3].mxu0 }
 0x209   : > { %v1135_v12 = vmul.f32 %v1332_v8, %v1971_v55  ;;  %v1088_v14 = vpop.f32.mrb[3].mxu1  ;;  %v1126_v28 = vmul.f32 %v1971_v55, %v1048_v13 }
 0x20a   : > { %v1134_v15 = vmul.f32 %v1971_v55, %v1088_v14  ;;  %v1150_v30 = vadd.f32 %v1976_v56, %v1127_v9 }
 0x20b   : > { %v1158_v29 = vadd.f32 %v1976_v56, %v1135_v12  ;;  %v1149_v31 = vadd.f32 %v1976_v56, %v1126_v28 }
 0x20c   : > { %v1157_v17 = vadd.f32 %v1976_v56, %v1134_v15  ;;  %v1166_v18 = vmax.f32 %v1150_v30, 0.0 }
 0x20d   : > { %v1174_v21 = vmax.f32 %v1158_v29, 0.0  ;;  %v1165_v32 = vmax.f32 %v1149_v31, 0.0 }
 0x20e   : > { %v1173_v19 = vmax.f32 %v1157_v17, 0.0  ;;  %1183 = vst.msk [vmem:[%s1988_s24 + $0x18] sm:$0xff] %vm1179_vm15, %v1166_v18 }
 0x20f   : > { %1191 = vst.msk [vmem:[%s1988_s24 + $0x58] sm:$0xff] %vm1179_vm15, %v1174_v21  ;;  %1182 = vst.msk [vmem:[%s1988_s24 + $0x10] sm:$0xff] %vm1179_vm15, %v1165_v32 }
 0x210   : > { %1190 = vst.msk [vmem:[%s1988_s24 + $0x50] sm:$0xff] %vm1179_vm15, %v1173_v19 }
 0x243   : > { %v1335_v23 = vpop.f32.mrb[4].mxu1 }
 0x244   : > { %v1323_v20 = vpop.f32.mrb[4].mxu0  ;;  %v1137_v25 = vmul.f32 %v1335_v23, %v1971_v55  ;;  %v1098_v27 = vpop.f32.mrb[5].mxu1 }
 0x245   : > { %v1129_v24 = vmul.f32 %v1323_v20, %v1971_v55  ;;  %v1058_v26 = vpop.f32.mrb[5].mxu0  ;;  %v1136_v34 = vmul.f32 %v1971_v55, %v1098_v27 }
 0x246   : > { %v1128_v33 = vmul.f32 %v1971_v55, %v1058_v26  ;;  %v1160_v35 = vadd.f32 %v1976_v56, %v1137_v25 }
 0x247   : > { %v1152_v36 = vadd.f32 %v1976_v56, %v1129_v24  ;;  %v1159_v38 = vadd.f32 %v1976_v56, %v1136_v34 }
 0x248   : > { %v1151_v37 = vadd.f32 %v1976_v56, %v1128_v33  ;;  %v1176_v39 = vmax.f32 %v1160_v35, 0.0 }
 0x249   : > { %v1168_v11 = vmax.f32 %v1152_v36, 0.0  ;;  %v1175_v41 = vmax.f32 %v1159_v38, 0.0 }
 0x24a   : > { %v1167_v40 = vmax.f32 %v1151_v37, 0.0  ;;  %1193 = vst.msk [vmem:[%s1988_s24 + $0x68] sm:$0xff] %vm1179_vm15, %v1176_v39 }
 0x24b   : > { %1185 = vst.msk [vmem:[%s1988_s24 + $0x28] sm:$0xff] %vm1179_vm15, %v1168_v11  ;;  %1192 = vst.msk [vmem:[%s1988_s24 + $0x60] sm:$0xff] %vm1179_vm15, %v1175_v41 }
 0x24c   : > { %1184 = vst.msk [vmem:[%s1988_s24 + $0x20] sm:$0xff] %vm1179_vm15, %v1167_v40 }
 0x25f   : > { %v1338_v43 = vpop.f32.mrb[6].mxu1 }
 0x260   : > { %v1326_v16 = vpop.f32.mrb[6].mxu0  ;;  %v1139_v45 = vmul.f32 %v1338_v43, %v1971_v55  ;;  %v1108_v46 = vpop.f32.mrb[7].mxu1 }
 0x261   : > { %v1131_v44 = vmul.f32 %v1326_v16, %v1971_v55  ;;  %v1068_v42 = vpop.f32.mrb[7].mxu0  ;;  %v1138_v48 = vmul.f32 %v1971_v55, %v1108_v46 }
 0x262   : > { %v1130_v47 = vmul.f32 %v1971_v55, %v1068_v42  ;;  %v1162_v49 = vadd.f32 %v1976_v56, %v1139_v45 }
 0x263   : > { %v1154_v50 = vadd.f32 %v1976_v56, %v1131_v44  ;;  %v1161_v51 = vadd.f32 %v1976_v56, %v1138_v48 }
 0x264   : > { %v1153_v54 = vadd.f32 %v1976_v56, %v1130_v47  ;;  %v1178_v53 = vmax.f32 %v1162_v49, 0.0 }
 0x265   : > { %v1170_v52 = vmax.f32 %v1154_v50, 0.0  ;;  %v1177_v10 = vmax.f32 %v1161_v51, 0.0 }
 0x266   : > { %v1169_v58 = vmax.f32 %v1153_v54, 0.0  ;;  %1195 = vst.msk [vmem:[%s1988_s24 + $0x78] sm:$0xff] %vm1179_vm15, %v1178_v53 }
 0x267   : > { %1187 = vst.msk [vmem:[%s1988_s24 + $0x38] sm:$0xff] %vm1179_vm15, %v1170_v52  ;;  %1194 = vst.msk [vmem:[%s1988_s24 + $0x70] sm:$0xff] %vm1179_vm15, %v1177_v10 }
 0x268   : > { %1186 = vst.msk [vmem:[%s1988_s24 + $0x30] sm:$0xff] %vm1179_vm15, %v1169_v58 }
 0x269 PF: > { %s14_s15 = sadd.s32 1, %s1383_s15  }
 0x26a   : > { %p11_p4 = scmp.ge.s32.totalorder %s14_s15, 6  }
 0x26c   :  { %13 = sbr.rel (!%p11_p4) target bundleno = 1 (0x1), region = 66 }

</bundles_post_ra>
